<compile_context>
chip_gen: v6e
topology: v6e:2x2x1
jax: 0.10.0
libtpu: 0.0.40
codegen_flags: <defaults>
</compile_context>

<pallas_src>
import jax
import jax.numpy as jnp
from jax import lax
from jax.experimental import pallas as pl
from jax.experimental.pallas import tpu as pltpu

LANE = 128  # TPU vreg lane width


def _round_up(x, m):
    return (x + m - 1) // m * m


def _reorder_pad_gates(m, H, Hp):
    """Reorder gate blocks from PyTorch's (i, f, g, o) to (i, f, o, g) and pad each to Hp cols."""
    order = (0, 1, 3, 2)  # i, f, o, g
    parts = [m[..., k * H:(k + 1) * H] for k in order]
    if Hp != H:
        pad = [(0, 0)] * (m.ndim - 1) + [(0, Hp - H)]
        parts = [jnp.pad(p, pad) for p in parts]
    return jnp.concatenate(parts, axis=-1)


def _lstm_kernel(xproj_ref, h0_ref, c0_ref, whh_ref, out_ref, hT_ref, cT_ref, h_sc, c_sc):
    """One (batch_tile, seq_tile) block of the LSTM recurrence.

    xproj_ref : (T_S, T_B, 4*Hp) bf16  pre-computed x@W_ih^T + b_ih + b_hh (gate order i,f,o,g)
    h0_ref    : (T_B, Hp) f32          initial hidden (used only on the first seq block)
    c0_ref    : (T_B, Hp) f32          initial cell   (used only on the first seq block)
    whh_ref   : (Hp, 4*Hp) bf16        recurrent weight (pre-transposed, gate-padded, i,f,o,g)
    out_ref   : (T_S, T_B, Hp) f32     per-step hidden states (time-major)
    hT_ref    : (T_B, Hp) f32          final hidden state (written on last seq block)
    cT_ref    : (T_B, Hp) f32          final cell state   (written on last seq block)
    h_sc,c_sc : (T_B, Hp) f32 VMEM scratch — recurrence carry across seq blocks
    """
    s_blk = pl.program_id(1)
    T_S = xproj_ref.shape[0]
    Hp = h0_ref.shape[-1]

    @pl.when(s_blk == 0)
    def _():
        h_sc[...] = h0_ref[...]
        c_sc[...] = c0_ref[...]

    def step(t, carry):
        h_prev, c_prev = carry  # fp32 (T_B, Hp) held in vregs across the (small) unroll
        # Only the recurrent half of the gate pre-activation is computed per step; bf16
        # operands feed the MXU, accumulation + elementwise math stay fp32.
        gates = xproj_ref[t].astype(jnp.float32) + jnp.dot(
            h_prev.astype(jnp.bfloat16), whh_ref[...],
            preferred_element_type=jnp.float32)              # (T_B, 4*Hp)
        # Gate order (i, f, o, g): one wide sigmoid + one tanh per step (single EUP).
        sig = jax.nn.sigmoid(gates[:, 0:3 * Hp])
        i_g = sig[:, 0 * Hp:1 * Hp]
        f_g = sig[:, 1 * Hp:2 * Hp]
        o_g = sig[:, 2 * Hp:3 * Hp]
        g_g = jnp.tanh(gates[:, 3 * Hp:4 * Hp])
        c_new = f_g * c_prev + i_g * g_g
        h_new = o_g * jnp.tanh(c_new)
        out_ref[t] = h_new                                   # lane-dense (T_B, Hp) store
        return h_new, c_new

    hT, cT = lax.fori_loop(0, T_S, step, (h_sc[...], c_sc[...]),
                           unroll=max(1, min(T_S, 8)))
    h_sc[...] = hT
    c_sc[...] = cT

    @pl.when(s_blk == pl.num_programs(1) - 1)
    def _():
        hT_ref[...] = hT
        cT_ref[...] = cT


def lstm_forward_pallas(xproj_tm, h0, c0, w_hh_padded, *, seq_tile=32, batch_tile=None):
    """xproj_tm: (S, B, 4*Hp) bf16; h0/c0: (B, Hp) f32; w_hh_padded: (Hp, 4*Hp) bf16."""
    S, B, G = xproj_tm.shape
    Hp = h0.shape[-1]
    assert G == 4 * Hp

    t_s = min(seq_tile, S)
    assert S % t_s == 0, "S must be divisible by seq_tile"
    t_b = B if batch_tile is None else min(batch_tile, B)
    assert B % t_b == 0, "B must be divisible by batch_tile"
    # xproj is bf16: its second-minor block dim must be sublane-pack friendly (16) or the full dim.
    assert t_b == B or t_b % 16 == 0, "batch_tile must be a multiple of 16 (bf16 packing) or == B"
    grid = (B // t_b, S // t_s)

    flops = 2 * S * B * Hp * (4 * Hp) + 12 * S * B * Hp
    transcendentals = 5 * S * B * Hp
    bytes_accessed = (xproj_tm.size * 2 + S * B * Hp * 4 + w_hh_padded.size * 2
                      + 6 * B * Hp * 4)

    out_tm, hT, cT = pl.pallas_call(
        _lstm_kernel,
        out_shape=(
            jax.ShapeDtypeStruct((S, B, Hp), jnp.float32),
            jax.ShapeDtypeStruct((B, Hp), jnp.float32),
            jax.ShapeDtypeStruct((B, Hp), jnp.float32),
        ),
        grid_spec=pltpu.PrefetchScalarGridSpec(
            num_scalar_prefetch=0,
            grid=grid,
            in_specs=[
                pl.BlockSpec((t_s, t_b, 4 * Hp), lambda b, s: (s, b, 0)),
                pl.BlockSpec((t_b, Hp), lambda b, s: (b, 0)),
                pl.BlockSpec((t_b, Hp), lambda b, s: (b, 0)),
                pl.BlockSpec((Hp, 4 * Hp), lambda b, s: (0, 0)),
            ],
            out_specs=[
                pl.BlockSpec((t_s, t_b, Hp), lambda b, s: (s, b, 0)),
                pl.BlockSpec((t_b, Hp), lambda b, s: (b, 0)),
                pl.BlockSpec((t_b, Hp), lambda b, s: (b, 0)),
            ],
            scratch_shapes=[
                pltpu.VMEM((t_b, Hp), jnp.float32),   # h carry
                pltpu.VMEM((t_b, Hp), jnp.float32),   # c carry
            ],
        ),
        compiler_params=pltpu.CompilerParams(
            # batch tiles are independent (megacore on v7x); seq blocks carry h/c sequentially.
            dimension_semantics=("parallel", "arbitrary"),
            vmem_limit_bytes=48 * 1024 * 1024,  # headroom under v7x's 64 MiB physical VMEM
        ),
        cost_estimate=pl.CostEstimate(
            flops=flops, transcendentals=transcendentals, bytes_accessed=bytes_accessed),
    )(xproj_tm, h0, c0, w_hh_padded)
    return out_tm, hT, cT


class EncoderRNNPallas:
    """JAX/Pallas port of EncoderRNN (embedding + 1-layer LSTM, batch_first)."""

    def __init__(self, in_size, hidden_size, key, dropout=0.1, seq_tile=32, batch_tile=None):
        self.hidden_size = hidden_size
        self.hp = _round_up(hidden_size, LANE)           # lane-dense padded hidden size
        self.seq_tile = seq_tile
        self.batch_tile = batch_tile
        H, Hp = hidden_size, self.hp
        k_emb, k_wih, k_whh, k_bih, k_bhh = jax.random.split(key, 5)
        bound = 1.0 / jnp.sqrt(hidden_size)
        # nn.Embedding: N(0,1); nn.LSTM: U(-1/sqrt(H), 1/sqrt(H)); PyTorch gate order (i, f, g, o).
        self.embedding = jax.random.normal(k_emb, (in_size, H), jnp.float32)
        self.w_ih_t = jax.random.uniform(k_wih, (H, 4 * H), jnp.float32, -bound, bound)
        self.w_hh_t = jax.random.uniform(k_whh, (H, 4 * H), jnp.float32, -bound, bound)
        b_ih = jax.random.uniform(k_bih, (4 * H,), jnp.float32, -bound, bound)
        b_hh = jax.random.uniform(k_bhh, (4 * H,), jnp.float32, -bound, bound)
        self.bias = b_ih + b_hh

        # Recurrent weight: gates reordered to (i,f,o,g), padded to (Hp, 4*Hp), bf16 for the MXU.
        whh_cols = _reorder_pad_gates(self.w_hh_t, H, Hp)             # (H, 4*Hp)
        self.w_hh_padded = jnp.pad(whh_cols, ((0, Hp - H), (0, 0))).astype(jnp.bfloat16)

        # Fold embedding lookup + input projection + both biases into one gather table:
        #   emb_proj[v] = embedding[v] @ W_ih^T + (b_ih + b_hh)
        # Stored bf16 (largest streamed operand); upcast to fp32 inside the kernel.
        emb_proj = self.embedding @ self.w_ih_t + self.bias           # (vocab, 4H) f32
        self.emb_proj_padded = _reorder_pad_gates(emb_proj, H, Hp).astype(jnp.bfloat16)

    def forward(self, tokens, prev_state, seq_length=None):
        # tokens: (B, S) int32 ; prev_state: (h0, c0) each (1, B, H).
        # NOTE: the original PyTorch forward also ignores seq_length (no packing).
        H, Hp = self.hidden_size, self.hp
        h0, c0 = prev_state
        # Time-major gather of the pre-projected embedding: one bf16 gather replaces the
        # embedding lookup, the (S*B,H)@(H,4H) input matmul, the bias broadcast, and the
        # activation transpose.
        xproj_tm = jnp.take(self.emb_proj_padded, tokens.T, axis=0, mode='clip')  # (S,B,4*Hp) bf16
        pad = ((0, 0), (0, Hp - H))
        h0p = jnp.pad(h0[0], pad)
        c0p = jnp.pad(c0[0], pad)
        out_tm, hT, cT = lstm_forward_pallas(
            xproj_tm, h0p, c0p, self.w_hh_padded,
            seq_tile=self.seq_tile, batch_tile=self.batch_tile)
        out = jnp.transpose(out_tm[:, :, :H], (1, 0, 2))              # (B, S, H) batch_first
        return out, (hT[None, :, :H], cT[None, :, :H])

    def init_hidden(self, batch):
        return (jnp.zeros((1, batch, self.hidden_size), jnp.float32),
                jnp.zeros((1, batch, self.hidden_size), jnp.float32))


def _lstm_reference(xproj_tm, h0, c0, w_hh_t_f32):
    """Pure-JAX reference (lax.scan) matching the kernel numerics.

    xproj_tm: (S, B, 4H) fp32 pre-activation input term (already bf16-quantized/dequantized),
    gate order (i, f, g, o); w_hh_t_f32: bf16-rounded recurrent weight in fp32.
    """
    H = h0.shape[-1]

    def step(carry, xp_t):
        h, c = carry
        h_q = h.astype(jnp.bfloat16).astype(jnp.float32)   # kernel feeds h to MXU in bf16
        g = xp_t + h_q @ w_hh_t_f32
        i = jax.nn.sigmoid(g[:, 0 * H:1 * H])
        f = jax.nn.sigmoid(g[:, 1 * H:2 * H])
        gg = jnp.tanh(g[:, 2 * H:3 * H])
        o = jax.nn.sigmoid(g[:, 3 * H:4 * H])
        c = f * c + i * gg
        h = o * jnp.tanh(c)
        return (h, c), h

    (hT, cT), outs = lax.scan(step, (h0, c0), xproj_tm)
    return outs, hT, cT


if __name__ == "__main__":
    VOCAB = 50
    HIDDEN = 32
    BATCH = 32      # matches the original module's batch_size; 2 batch tiles of 16
    SEQ = 16        # 2 seq blocks of 8 -> exercises the cross-block h/c carry

    key = jax.random.PRNGKey(0)
    k_model, k_tok = jax.random.split(key)

    enc = EncoderRNNPallas(VOCAB, HIDDEN, k_model, seq_tile=8, batch_tile=16)
    tokens = jax.random.randint(k_tok, (BATCH, SEQ), 0, VOCAB, dtype=jnp.int32)
    prev_state = enc.init_hidden(BATCH)

    out, (h_n, c_n) = enc.forward(tokens, prev_state, seq_length=SEQ)
    out = jax.block_until_ready(out)
    h_n = jax.block_until_ready(h_n)
    c_n = jax.block_until_ready(c_n)

    # Sanity check vs pure-JAX reference (same bf16-quantized xproj table + recurrent weight).
    emb_proj = enc.embedding @ enc.w_ih_t + enc.bias                  # (V, 4H) f32, (i,f,g,o)
    emb_proj_q = emb_proj.astype(jnp.bfloat16).astype(jnp.float32)
    xproj_ref_tm = jnp.take(emb_proj_q, tokens.T, axis=0)             # (S, B, 4H) f32
    whh_f32 = enc.w_hh_t.astype(jnp.bfloat16).astype(jnp.float32)
    ref_out_tm, ref_h, ref_c = _lstm_reference(
        xproj_ref_tm, prev_state[0][0], prev_state[1][0], whh_f32)
    ref_out = jnp.transpose(ref_out_tm, (1, 0, 2))

    assert out.shape == (BATCH, SEQ, HIDDEN)
    assert h_n.shape == (1, BATCH, HIDDEN) and c_n.shape == (1, BATCH, HIDDEN)
    assert jnp.allclose(out, ref_out, atol=2e-3), "LSTM output mismatch"
    assert jnp.allclose(h_n[0], ref_h, atol=2e-3), "h_n mismatch"
    assert jnp.allclose(c_n[0], ref_c, atol=2e-3), "c_n mismatch"

    print("KERNEL_OK")
</pallas_src>

<mosaic_0001>
module attributes {stable_mosaic.version = 11 : i64} {
  func.func @_lstm_kernel(%arg0: i32, %arg1: i32, %arg2: memref<8x16x512xbf16, #tpu.memory_space<vmem>>, %arg3: memref<16x128xf32, #tpu.memory_space<vmem>>, %arg4: memref<16x128xf32, #tpu.memory_space<vmem>>, %arg5: memref<128x512xbf16, #tpu.memory_space<vmem>>, %arg6: memref<8x16x128xf32, #tpu.memory_space<vmem>>, %arg7: memref<16x128xf32, #tpu.memory_space<vmem>>, %arg8: memref<16x128xf32, #tpu.memory_space<vmem>>, %arg9: memref<16x128xf32, #tpu.memory_space<vmem>>, %arg10: memref<16x128xf32, #tpu.memory_space<vmem>>) attributes {dimension_semantics = [#tpu.dimension_semantics<parallel>, #tpu.dimension_semantics<arbitrary>], iteration_bounds = array<i64: 2, 2>, scalar_prefetch = 0 : i64, scratch_operands = 2 : i64, tpu.core_type = #tpu.core_type<tc>, window_params = [{transform_indices = @transform_0, window_bounds = array<i64: 8, 16, 512>}, {transform_indices = @transform_1, window_bounds = array<i64: 16, 128>}, {transform_indices = @transform_2, window_bounds = array<i64: 16, 128>}, {pipeline_mode = #tpu.pipeline_mode<synchronous>, transform_indices = @transform_3, window_bounds = array<i64: 128, 512>}, {transform_indices = @transform_4, window_bounds = array<i64: 8, 16, 128>}, {transform_indices = @transform_5, window_bounds = array<i64: 16, 128>}, {transform_indices = @transform_6, window_bounds = array<i64: 16, 128>}]} {
    %c0_i32 = arith.constant 0 : i32
    %0 = arith.cmpi eq, %arg1, %c0_i32 : i32
    %1 = arith.extui %0 : i1 to i32
    %c0_i32_0 = arith.constant 0 : i32
    %2 = arith.cmpi ne, %1, %c0_i32_0 : i32
    scf.if %2 {
      %c0_74 = arith.constant 0 : index
      %c0_75 = arith.constant 0 : index
      %234 = vector.load %arg3[%c0_74, %c0_75] : memref<16x128xf32, #tpu.memory_space<vmem>>, vector<16x128xf32>
      %c0_76 = arith.constant 0 : index
      %c0_77 = arith.constant 0 : index
      %235 = vector.load %arg9[%c0_76, %c0_77] : memref<16x128xf32, #tpu.memory_space<vmem>>, vector<16x128xf32>
      tpu.vector_store %arg9[%c0_76, %c0_77], %234 {strides = array<i32>} : memref<16x128xf32, #tpu.memory_space<vmem>>, vector<16x128xf32>,
      %c0_78 = arith.constant 0 : index
      %c0_79 = arith.constant 0 : index
      %236 = vector.load %arg4[%c0_78, %c0_79] : memref<16x128xf32, #tpu.memory_space<vmem>>, vector<16x128xf32>
      %c0_80 = arith.constant 0 : index
      %c0_81 = arith.constant 0 : index
      %237 = vector.load %arg10[%c0_80, %c0_81] : memref<16x128xf32, #tpu.memory_space<vmem>>, vector<16x128xf32>
      tpu.vector_store %arg10[%c0_80, %c0_81], %236 {strides = array<i32>} : memref<16x128xf32, #tpu.memory_space<vmem>>, vector<16x128xf32>,
    } else {
    }
    %c0 = arith.constant 0 : index
    %c0_1 = arith.constant 0 : index
    %3 = vector.load %arg9[%c0, %c0_1] : memref<16x128xf32, #tpu.memory_space<vmem>>, vector<16x128xf32>
    %c0_2 = arith.constant 0 : index
    %c0_3 = arith.constant 0 : index
    %4 = vector.load %arg10[%c0_2, %c0_3] : memref<16x128xf32, #tpu.memory_space<vmem>>, vector<16x128xf32>
    %c0_i32_4 = arith.constant 0 : i32
    %5 = arith.index_cast %c0_i32_4 : i32 to index
    %c0_5 = arith.constant 0 : index
    %c0_6 = arith.constant 0 : index
    %6 = vector.load %arg2[%5, %c0_5, %c0_6] : memref<8x16x512xbf16, #tpu.memory_space<vmem>>, vector<1x16x512xbf16>
    %7 = vector.shape_cast %6 : vector<1x16x512xbf16> to vector<16x512xbf16>
    %8 = arith.extf %7 : vector<16x512xbf16> to vector<16x512xf32>
    %9 = arith.truncf %3 : vector<16x128xf32> to vector<16x128xbf16>
    %c0_7 = arith.constant 0 : index
    %c0_8 = arith.constant 0 : index
    %10 = vector.load %arg5[%c0_7, %c0_8] : memref<128x512xbf16, #tpu.memory_space<vmem>>, vector<128x512xbf16>
    %cst = arith.constant dense<0.000000e+00> : vector<16x512xf32>
    %11 = tpu.matmul %9, %10, %cst {dimension_numbers = #tpu.dot_dimension_numbers<[1], [0], [0], [1], [0, 0, 1, 1], [], []>} : vector<16x128xbf16>, vector<128x512xbf16>, vector<16x512xf32> -> vector<16x512xf32>
    %12 = arith.addf %8, %11 : vector<16x512xf32>
    %13 = vector.extract_strided_slice %12 {offsets = [0, 0], sizes = [16, 384], strides = [1, 1]} : vector<16x512xf32> to vector<16x384xf32>
    %14 = arith.negf %13 : vector<16x384xf32>
    %15 = math.exp %14 : vector<16x384xf32>
    %cst_9 = arith.constant 1.000000e+00 : f32
    %16 = vector.broadcast %cst_9 : f32 to vector<16x384xf32>
    %17 = arith.addf %16, %15 : vector<16x384xf32>
    %18 = arith.divf %16, %17 : vector<16x384xf32>
    %19 = vector.extract_strided_slice %18 {offsets = [0, 0], sizes = [16, 128], strides = [1, 1]} : vector<16x384xf32> to vector<16x128xf32>
    %20 = vector.extract_strided_slice %18 {offsets = [0, 128], sizes = [16, 128], strides = [1, 1]} : vector<16x384xf32> to vector<16x128xf32>
    %21 = vector.extract_strided_slice %18 {offsets = [0, 256], sizes = [16, 128], strides = [1, 1]} : vector<16x384xf32> to vector<16x128xf32>
    %22 = vector.extract_strided_slice %12 {offsets = [0, 384], sizes = [16, 128], strides = [1, 1]} : vector<16x512xf32> to vector<16x128xf32>
    %23 = math.tanh %22 : vector<16x128xf32>
    %24 = arith.mulf %20, %4 : vector<16x128xf32>
    %25 = arith.mulf %19, %23 : vector<16x128xf32>
    %26 = arith.addf %24, %25 : vector<16x128xf32>
    %27 = math.tanh %26 : vector<16x128xf32>
    %28 = arith.mulf %21, %27 : vector<16x128xf32>
    %29 = arith.index_cast %c0_i32_4 : i32 to index
    %c0_10 = arith.constant 0 : index
    %c0_11 = arith.constant 0 : index
    %30 = vector.load %arg6[%29, %c0_10, %c0_11] : memref<8x16x128xf32, #tpu.memory_space<vmem>>, vector<1x16x128xf32>
    %31 = vector.shape_cast %30 : vector<1x16x128xf32> to vector<16x128xf32>
    %32 = vector.shape_cast %28 : vector<16x128xf32> to vector<1x16x128xf32>
    tpu.vector_store %arg6[%29, %c0_10, %c0_11], %32 {strides = array<i32>} : memref<8x16x128xf32, #tpu.memory_space<vmem>>, vector<1x16x128xf32>,
    %c1_i32 = arith.constant 1 : i32
    %33 = arith.index_cast %c1_i32 : i32 to index
    %c0_12 = arith.constant 0 : index
    %c0_13 = arith.constant 0 : index
    %34 = vector.load %arg2[%33, %c0_12, %c0_13] : memref<8x16x512xbf16, #tpu.memory_space<vmem>>, vector<1x16x512xbf16>
    %35 = vector.shape_cast %34 : vector<1x16x512xbf16> to vector<16x512xbf16>
    %36 = arith.extf %35 : vector<16x512xbf16> to vector<16x512xf32>
    %37 = arith.truncf %28 : vector<16x128xf32> to vector<16x128xbf16>
    %c0_14 = arith.constant 0 : index
    %c0_15 = arith.constant 0 : index
    %38 = vector.load %arg5[%c0_14, %c0_15] : memref<128x512xbf16, #tpu.memory_space<vmem>>, vector<128x512xbf16>
    %cst_16 = arith.constant dense<0.000000e+00> : vector<16x512xf32>
    %39 = tpu.matmul %37, %38, %cst_16 {dimension_numbers = #tpu.dot_dimension_numbers<[1], [0], [0], [1], [0, 0, 1, 1], [], []>} : vector<16x128xbf16>, vector<128x512xbf16>, vector<16x512xf32> -> vector<16x512xf32>
    %40 = arith.addf %36, %39 : vector<16x512xf32>
    %41 = vector.extract_strided_slice %40 {offsets = [0, 0], sizes = [16, 384], strides = [1, 1]} : vector<16x512xf32> to vector<16x384xf32>
    %42 = arith.negf %41 : vector<16x384xf32>
    %43 = math.exp %42 : vector<16x384xf32>
    %cst_17 = arith.constant 1.000000e+00 : f32
    %44 = vector.broadcast %cst_17 : f32 to vector<16x384xf32>
    %45 = arith.addf %44, %43 : vector<16x384xf32>
    %46 = arith.divf %44, %45 : vector<16x384xf32>
    %47 = vector.extract_strided_slice %46 {offsets = [0, 0], sizes = [16, 128], strides = [1, 1]} : vector<16x384xf32> to vector<16x128xf32>
    %48 = vector.extract_strided_slice %46 {offsets = [0, 128], sizes = [16, 128], strides = [1, 1]} : vector<16x384xf32> to vector<16x128xf32>
    %49 = vector.extract_strided_slice %46 {offsets = [0, 256], sizes = [16, 128], strides = [1, 1]} : vector<16x384xf32> to vector<16x128xf32>
    %50 = vector.extract_strided_slice %40 {offsets = [0, 384], sizes = [16, 128], strides = [1, 1]} : vector<16x512xf32> to vector<16x128xf32>
    %51 = math.tanh %50 : vector<16x128xf32>
    %52 = arith.mulf %48, %26 : vector<16x128xf32>
    %53 = arith.mulf %47, %51 : vector<16x128xf32>
    %54 = arith.addf %52, %53 : vector<16x128xf32>
    %55 = math.tanh %54 : vector<16x128xf32>
    %56 = arith.mulf %49, %55 : vector<16x128xf32>
    %57 = arith.index_cast %c1_i32 : i32 to index
    %c0_18 = arith.constant 0 : index
    %c0_19 = arith.constant 0 : index
    %58 = vector.load %arg6[%57, %c0_18, %c0_19] : memref<8x16x128xf32, #tpu.memory_space<vmem>>, vector<1x16x128xf32>
    %59 = vector.shape_cast %58 : vector<1x16x128xf32> to vector<16x128xf32>
    %60 = vector.shape_cast %56 : vector<16x128xf32> to vector<1x16x128xf32>
    tpu.vector_store %arg6[%57, %c0_18, %c0_19], %60 {strides = array<i32>} : memref<8x16x128xf32, #tpu.memory_space<vmem>>, vector<1x16x128xf32>,
    %c2_i32 = arith.constant 2 : i32
    %61 = arith.index_cast %c2_i32 : i32 to index
    %c0_20 = arith.constant 0 : index
    %c0_21 = arith.constant 0 : index
    %62 = vector.load %arg2[%61, %c0_20, %c0_21] : memref<8x16x512xbf16, #tpu.memory_space<vmem>>, vector<1x16x512xbf16>
    %63 = vector.shape_cast %62 : vector<1x16x512xbf16> to vector<16x512xbf16>
    %64 = arith.extf %63 : vector<16x512xbf16> to vector<16x512xf32>
    %65 = arith.truncf %56 : vector<16x128xf32> to vector<16x128xbf16>
    %c0_22 = arith.constant 0 : index
    %c0_23 = arith.constant 0 : index
    %66 = vector.load %arg5[%c0_22, %c0_23] : memref<128x512xbf16, #tpu.memory_space<vmem>>, vector<128x512xbf16>
    %cst_24 = arith.constant dense<0.000000e+00> : vector<16x512xf32>
    %67 = tpu.matmul %65, %66, %cst_24 {dimension_numbers = #tpu.dot_dimension_numbers<[1], [0], [0], [1], [0, 0, 1, 1], [], []>} : vector<16x128xbf16>, vector<128x512xbf16>, vector<16x512xf32> -> vector<16x512xf32>
    %68 = arith.addf %64, %67 : vector<16x512xf32>
    %69 = vector.extract_strided_slice %68 {offsets = [0, 0], sizes = [16, 384], strides = [1, 1]} : vector<16x512xf32> to vector<16x384xf32>
    %70 = arith.negf %69 : vector<16x384xf32>
    %71 = math.exp %70 : vector<16x384xf32>
    %cst_25 = arith.constant 1.000000e+00 : f32
    %72 = vector.broadcast %cst_25 : f32 to vector<16x384xf32>
    %73 = arith.addf %72, %71 : vector<16x384xf32>
    %74 = arith.divf %72, %73 : vector<16x384xf32>
    %75 = vector.extract_strided_slice %74 {offsets = [0, 0], sizes = [16, 128], strides = [1, 1]} : vector<16x384xf32> to vector<16x128xf32>
    %76 = vector.extract_strided_slice %74 {offsets = [0, 128], sizes = [16, 128], strides = [1, 1]} : vector<16x384xf32> to vector<16x128xf32>
    %77 = vector.extract_strided_slice %74 {offsets = [0, 256], sizes = [16, 128], strides = [1, 1]} : vector<16x384xf32> to vector<16x128xf32>
    %78 = vector.extract_strided_slice %68 {offsets = [0, 384], sizes = [16, 128], strides = [1, 1]} : vector<16x512xf32> to vector<16x128xf32>
    %79 = math.tanh %78 : vector<16x128xf32>
    %80 = arith.mulf %76, %54 : vector<16x128xf32>
    %81 = arith.mulf %75, %79 : vector<16x128xf32>
    %82 = arith.addf %80, %81 : vector<16x128xf32>
    %83 = math.tanh %82 : vector<16x128xf32>
    %84 = arith.mulf %77, %83 : vector<16x128xf32>
    %85 = arith.index_cast %c2_i32 : i32 to index
    %c0_26 = arith.constant 0 : index
    %c0_27 = arith.constant 0 : index
    %86 = vector.load %arg6[%85, %c0_26, %c0_27] : memref<8x16x128xf32, #tpu.memory_space<vmem>>, vector<1x16x128xf32>
    %87 = vector.shape_cast %86 : vector<1x16x128xf32> to vector<16x128xf32>
    %88 = vector.shape_cast %84 : vector<16x128xf32> to vector<1x16x128xf32>
    tpu.vector_store %arg6[%85, %c0_26, %c0_27], %88 {strides = array<i32>} : memref<8x16x128xf32, #tpu.memory_space<vmem>>, vector<1x16x128xf32>,
    %c3_i32 = arith.constant 3 : i32
    %89 = arith.index_cast %c3_i32 : i32 to index
    %c0_28 = arith.constant 0 : index
    %c0_29 = arith.constant 0 : index
    %90 = vector.load %arg2[%89, %c0_28, %c0_29] : memref<8x16x512xbf16, #tpu.memory_space<vmem>>, vector<1x16x512xbf16>
    %91 = vector.shape_cast %90 : vector<1x16x512xbf16> to vector<16x512xbf16>
    %92 = arith.extf %91 : vector<16x512xbf16> to vector<16x512xf32>
    %93 = arith.truncf %84 : vector<16x128xf32> to vector<16x128xbf16>
    %c0_30 = arith.constant 0 : index
    %c0_31 = arith.constant 0 : index
    %94 = vector.load %arg5[%c0_30, %c0_31] : memref<128x512xbf16, #tpu.memory_space<vmem>>, vector<128x512xbf16>
    %cst_32 = arith.constant dense<0.000000e+00> : vector<16x512xf32>
    %95 = tpu.matmul %93, %94, %cst_32 {dimension_numbers = #tpu.dot_dimension_numbers<[1], [0], [0], [1], [0, 0, 1, 1], [], []>} : vector<16x128xbf16>, vector<128x512xbf16>, vector<16x512xf32> -> vector<16x512xf32>
    %96 = arith.addf %92, %95 : vector<16x512xf32>
    %97 = vector.extract_strided_slice %96 {offsets = [0, 0], sizes = [16, 384], strides = [1, 1]} : vector<16x512xf32> to vector<16x384xf32>
    %98 = arith.negf %97 : vector<16x384xf32>
    %99 = math.exp %98 : vector<16x384xf32>
    %cst_33 = arith.constant 1.000000e+00 : f32
    %100 = vector.broadcast %cst_33 : f32 to vector<16x384xf32>
    %101 = arith.addf %100, %99 : vector<16x384xf32>
    %102 = arith.divf %100, %101 : vector<16x384xf32>
    %103 = vector.extract_strided_slice %102 {offsets = [0, 0], sizes = [16, 128], strides = [1, 1]} : vector<16x384xf32> to vector<16x128xf32>
    %104 = vector.extract_strided_slice %102 {offsets = [0, 128], sizes = [16, 128], strides = [1, 1]} : vector<16x384xf32> to vector<16x128xf32>
    %105 = vector.extract_strided_slice %102 {offsets = [0, 256], sizes = [16, 128], strides = [1, 1]} : vector<16x384xf32> to vector<16x128xf32>
    %106 = vector.extract_strided_slice %96 {offsets = [0, 384], sizes = [16, 128], strides = [1, 1]} : vector<16x512xf32> to vector<16x128xf32>
    %107 = math.tanh %106 : vector<16x128xf32>
    %108 = arith.mulf %104, %82 : vector<16x128xf32>
    %109 = arith.mulf %103, %107 : vector<16x128xf32>
    %110 = arith.addf %108, %109 : vector<16x128xf32>
    %111 = math.tanh %110 : vector<16x128xf32>
    %112 = arith.mulf %105, %111 : vector<16x128xf32>
    %113 = arith.index_cast %c3_i32 : i32 to index
    %c0_34 = arith.constant 0 : index
    %c0_35 = arith.constant 0 : index
    %114 = vector.load %arg6[%113, %c0_34, %c0_35] : memref<8x16x128xf32, #tpu.memory_space<vmem>>, vector<1x16x128xf32>
    %115 = vector.shape_cast %114 : vector<1x16x128xf32> to vector<16x128xf32>
    %116 = vector.shape_cast %112 : vector<16x128xf32> to vector<1x16x128xf32>
    tpu.vector_store %arg6[%113, %c0_34, %c0_35], %116 {strides = array<i32>} : memref<8x16x128xf32, #tpu.memory_space<vmem>>, vector<1x16x128xf32>,
    %c4_i32 = arith.constant 4 : i32
    %117 = arith.index_cast %c4_i32 : i32 to index
    %c0_36 = arith.constant 0 : index
    %c0_37 = arith.constant 0 : index
    %118 = vector.load %arg2[%117, %c0_36, %c0_37] : memref<8x16x512xbf16, #tpu.memory_space<vmem>>, vector<1x16x512xbf16>
    %119 = vector.shape_cast %118 : vector<1x16x512xbf16> to vector<16x512xbf16>
    %120 = arith.extf %119 : vector<16x512xbf16> to vector<16x512xf32>
    %121 = arith.truncf %112 : vector<16x128xf32> to vector<16x128xbf16>
    %c0_38 = arith.constant 0 : index
    %c0_39 = arith.constant 0 : index
    %122 = vector.load %arg5[%c0_38, %c0_39] : memref<128x512xbf16, #tpu.memory_space<vmem>>, vector<128x512xbf16>
    %cst_40 = arith.constant dense<0.000000e+00> : vector<16x512xf32>
    %123 = tpu.matmul %121, %122, %cst_40 {dimension_numbers = #tpu.dot_dimension_numbers<[1], [0], [0], [1], [0, 0, 1, 1], [], []>} : vector<16x128xbf16>, vector<128x512xbf16>, vector<16x512xf32> -> vector<16x512xf32>
    %124 = arith.addf %120, %123 : vector<16x512xf32>
    %125 = vector.extract_strided_slice %124 {offsets = [0, 0], sizes = [16, 384], strides = [1, 1]} : vector<16x512xf32> to vector<16x384xf32>
    %126 = arith.negf %125 : vector<16x384xf32>
    %127 = math.exp %126 : vector<16x384xf32>
    %cst_41 = arith.constant 1.000000e+00 : f32
    %128 = vector.broadcast %cst_41 : f32 to vector<16x384xf32>
    %129 = arith.addf %128, %127 : vector<16x384xf32>
    %130 = arith.divf %128, %129 : vector<16x384xf32>
    %131 = vector.extract_strided_slice %130 {offsets = [0, 0], sizes = [16, 128], strides = [1, 1]} : vector<16x384xf32> to vector<16x128xf32>
    %132 = vector.extract_strided_slice %130 {offsets = [0, 128], sizes = [16, 128], strides = [1, 1]} : vector<16x384xf32> to vector<16x128xf32>
    %133 = vector.extract_strided_slice %130 {offsets = [0, 256], sizes = [16, 128], strides = [1, 1]} : vector<16x384xf32> to vector<16x128xf32>
    %134 = vector.extract_strided_slice %124 {offsets = [0, 384], sizes = [16, 128], strides = [1, 1]} : vector<16x512xf32> to vector<16x128xf32>
    %135 = math.tanh %134 : vector<16x128xf32>
    %136 = arith.mulf %132, %110 : vector<16x128xf32>
    %137 = arith.mulf %131, %135 : vector<16x128xf32>
    %138 = arith.addf %136, %137 : vector<16x128xf32>
    %139 = math.tanh %138 : vector<16x128xf32>
    %140 = arith.mulf %133, %139 : vector<16x128xf32>
    %141 = arith.index_cast %c4_i32 : i32 to index
    %c0_42 = arith.constant 0 : index
    %c0_43 = arith.constant 0 : index
    %142 = vector.load %arg6[%141, %c0_42, %c0_43] : memref<8x16x128xf32, #tpu.memory_space<vmem>>, vector<1x16x128xf32>
    %143 = vector.shape_cast %142 : vector<1x16x128xf32> to vector<16x128xf32>
    %144 = vector.shape_cast %140 : vector<16x128xf32> to vector<1x16x128xf32>
    tpu.vector_store %arg6[%141, %c0_42, %c0_43], %144 {strides = array<i32>} : memref<8x16x128xf32, #tpu.memory_space<vmem>>, vector<1x16x128xf32>,
    %c5_i32 = arith.constant 5 : i32
    %145 = arith.index_cast %c5_i32 : i32 to index
    %c0_44 = arith.constant 0 : index
    %c0_45 = arith.constant 0 : index
    %146 = vector.load %arg2[%145, %c0_44, %c0_45] : memref<8x16x512xbf16, #tpu.memory_space<vmem>>, vector<1x16x512xbf16>
    %147 = vector.shape_cast %146 : vector<1x16x512xbf16> to vector<16x512xbf16>
    %148 = arith.extf %147 : vector<16x512xbf16> to vector<16x512xf32>
    %149 = arith.truncf %140 : vector<16x128xf32> to vector<16x128xbf16>
    %c0_46 = arith.constant 0 : index
    %c0_47 = arith.constant 0 : index
    %150 = vector.load %arg5[%c0_46, %c0_47] : memref<128x512xbf16, #tpu.memory_space<vmem>>, vector<128x512xbf16>
    %cst_48 = arith.constant dense<0.000000e+00> : vector<16x512xf32>
    %151 = tpu.matmul %149, %150, %cst_48 {dimension_numbers = #tpu.dot_dimension_numbers<[1], [0], [0], [1], [0, 0, 1, 1], [], []>} : vector<16x128xbf16>, vector<128x512xbf16>, vector<16x512xf32> -> vector<16x512xf32>
    %152 = arith.addf %148, %151 : vector<16x512xf32>
    %153 = vector.extract_strided_slice %152 {offsets = [0, 0], sizes = [16, 384], strides = [1, 1]} : vector<16x512xf32> to vector<16x384xf32>
    %154 = arith.negf %153 : vector<16x384xf32>
    %155 = math.exp %154 : vector<16x384xf32>
    %cst_49 = arith.constant 1.000000e+00 : f32
    %156 = vector.broadcast %cst_49 : f32 to vector<16x384xf32>
    %157 = arith.addf %156, %155 : vector<16x384xf32>
    %158 = arith.divf %156, %157 : vector<16x384xf32>
    %159 = vector.extract_strided_slice %158 {offsets = [0, 0], sizes = [16, 128], strides = [1, 1]} : vector<16x384xf32> to vector<16x128xf32>
    %160 = vector.extract_strided_slice %158 {offsets = [0, 128], sizes = [16, 128], strides = [1, 1]} : vector<16x384xf32> to vector<16x128xf32>
    %161 = vector.extract_strided_slice %158 {offsets = [0, 256], sizes = [16, 128], strides = [1, 1]} : vector<16x384xf32> to vector<16x128xf32>
    %162 = vector.extract_strided_slice %152 {offsets = [0, 384], sizes = [16, 128], strides = [1, 1]} : vector<16x512xf32> to vector<16x128xf32>
    %163 = math.tanh %162 : vector<16x128xf32>
    %164 = arith.mulf %160, %138 : vector<16x128xf32>
    %165 = arith.mulf %159, %163 : vector<16x128xf32>
    %166 = arith.addf %164, %165 : vector<16x128xf32>
    %167 = math.tanh %166 : vector<16x128xf32>
    %168 = arith.mulf %161, %167 : vector<16x128xf32>
    %169 = arith.index_cast %c5_i32 : i32 to index
    %c0_50 = arith.constant 0 : index
    %c0_51 = arith.constant 0 : index
    %170 = vector.load %arg6[%169, %c0_50, %c0_51] : memref<8x16x128xf32, #tpu.memory_space<vmem>>, vector<1x16x128xf32>
    %171 = vector.shape_cast %170 : vector<1x16x128xf32> to vector<16x128xf32>
    %172 = vector.shape_cast %168 : vector<16x128xf32> to vector<1x16x128xf32>
    tpu.vector_store %arg6[%169, %c0_50, %c0_51], %172 {strides = array<i32>} : memref<8x16x128xf32, #tpu.memory_space<vmem>>, vector<1x16x128xf32>,
    %c6_i32 = arith.constant 6 : i32
    %173 = arith.index_cast %c6_i32 : i32 to index
    %c0_52 = arith.constant 0 : index
    %c0_53 = arith.constant 0 : index
    %174 = vector.load %arg2[%173, %c0_52, %c0_53] : memref<8x16x512xbf16, #tpu.memory_space<vmem>>, vector<1x16x512xbf16>
    %175 = vector.shape_cast %174 : vector<1x16x512xbf16> to vector<16x512xbf16>
    %176 = arith.extf %175 : vector<16x512xbf16> to vector<16x512xf32>
    %177 = arith.truncf %168 : vector<16x128xf32> to vector<16x128xbf16>
    %c0_54 = arith.constant 0 : index
    %c0_55 = arith.constant 0 : index
    %178 = vector.load %arg5[%c0_54, %c0_55] : memref<128x512xbf16, #tpu.memory_space<vmem>>, vector<128x512xbf16>
    %cst_56 = arith.constant dense<0.000000e+00> : vector<16x512xf32>
    %179 = tpu.matmul %177, %178, %cst_56 {dimension_numbers = #tpu.dot_dimension_numbers<[1], [0], [0], [1], [0, 0, 1, 1], [], []>} : vector<16x128xbf16>, vector<128x512xbf16>, vector<16x512xf32> -> vector<16x512xf32>
    %180 = arith.addf %176, %179 : vector<16x512xf32>
    %181 = vector.extract_strided_slice %180 {offsets = [0, 0], sizes = [16, 384], strides = [1, 1]} : vector<16x512xf32> to vector<16x384xf32>
    %182 = arith.negf %181 : vector<16x384xf32>
    %183 = math.exp %182 : vector<16x384xf32>
    %cst_57 = arith.constant 1.000000e+00 : f32
    %184 = vector.broadcast %cst_57 : f32 to vector<16x384xf32>
    %185 = arith.addf %184, %183 : vector<16x384xf32>
    %186 = arith.divf %184, %185 : vector<16x384xf32>
    %187 = vector.extract_strided_slice %186 {offsets = [0, 0], sizes = [16, 128], strides = [1, 1]} : vector<16x384xf32> to vector<16x128xf32>
    %188 = vector.extract_strided_slice %186 {offsets = [0, 128], sizes = [16, 128], strides = [1, 1]} : vector<16x384xf32> to vector<16x128xf32>
    %189 = vector.extract_strided_slice %186 {offsets = [0, 256], sizes = [16, 128], strides = [1, 1]} : vector<16x384xf32> to vector<16x128xf32>
    %190 = vector.extract_strided_slice %180 {offsets = [0, 384], sizes = [16, 128], strides = [1, 1]} : vector<16x512xf32> to vector<16x128xf32>
    %191 = math.tanh %190 : vector<16x128xf32>
    %192 = arith.mulf %188, %166 : vector<16x128xf32>
    %193 = arith.mulf %187, %191 : vector<16x128xf32>
    %194 = arith.addf %192, %193 : vector<16x128xf32>
    %195 = math.tanh %194 : vector<16x128xf32>
    %196 = arith.mulf %189, %195 : vector<16x128xf32>
    %197 = arith.index_cast %c6_i32 : i32 to index
    %c0_58 = arith.constant 0 : index
    %c0_59 = arith.constant 0 : index
    %198 = vector.load %arg6[%197, %c0_58, %c0_59] : memref<8x16x128xf32, #tpu.memory_space<vmem>>, vector<1x16x128xf32>
    %199 = vector.shape_cast %198 : vector<1x16x128xf32> to vector<16x128xf32>
    %200 = vector.shape_cast %196 : vector<16x128xf32> to vector<1x16x128xf32>
    tpu.vector_store %arg6[%197, %c0_58, %c0_59], %200 {strides = array<i32>} : memref<8x16x128xf32, #tpu.memory_space<vmem>>, vector<1x16x128xf32>,
    %c7_i32 = arith.constant 7 : i32
    %201 = arith.index_cast %c7_i32 : i32 to index
    %c0_60 = arith.constant 0 : index
    %c0_61 = arith.constant 0 : index
    %202 = vector.load %arg2[%201, %c0_60, %c0_61] : memref<8x16x512xbf16, #tpu.memory_space<vmem>>, vector<1x16x512xbf16>
    %203 = vector.shape_cast %202 : vector<1x16x512xbf16> to vector<16x512xbf16>
    %204 = arith.extf %203 : vector<16x512xbf16> to vector<16x512xf32>
    %205 = arith.truncf %196 : vector<16x128xf32> to vector<16x128xbf16>
    %c0_62 = arith.constant 0 : index
    %c0_63 = arith.constant 0 : index
    %206 = vector.load %arg5[%c0_62, %c0_63] : memref<128x512xbf16, #tpu.memory_space<vmem>>, vector<128x512xbf16>
    %cst_64 = arith.constant dense<0.000000e+00> : vector<16x512xf32>
    %207 = tpu.matmul %205, %206, %cst_64 {dimension_numbers = #tpu.dot_dimension_numbers<[1], [0], [0], [1], [0, 0, 1, 1], [], []>} : vector<16x128xbf16>, vector<128x512xbf16>, vector<16x512xf32> -> vector<16x512xf32>
    %208 = arith.addf %204, %207 : vector<16x512xf32>
    %209 = vector.extract_strided_slice %208 {offsets = [0, 0], sizes = [16, 384], strides = [1, 1]} : vector<16x512xf32> to vector<16x384xf32>
    %210 = arith.negf %209 : vector<16x384xf32>
    %211 = math.exp %210 : vector<16x384xf32>
    %cst_65 = arith.constant 1.000000e+00 : f32
    %212 = vector.broadcast %cst_65 : f32 to vector<16x384xf32>
    %213 = arith.addf %212, %211 : vector<16x384xf32>
    %214 = arith.divf %212, %213 : vector<16x384xf32>
    %215 = vector.extract_strided_slice %214 {offsets = [0, 0], sizes = [16, 128], strides = [1, 1]} : vector<16x384xf32> to vector<16x128xf32>
    %216 = vector.extract_strided_slice %214 {offsets = [0, 128], sizes = [16, 128], strides = [1, 1]} : vector<16x384xf32> to vector<16x128xf32>
    %217 = vector.extract_strided_slice %214 {offsets = [0, 256], sizes = [16, 128], strides = [1, 1]} : vector<16x384xf32> to vector<16x128xf32>
    %218 = vector.extract_strided_slice %208 {offsets = [0, 384], sizes = [16, 128], strides = [1, 1]} : vector<16x512xf32> to vector<16x128xf32>
    %219 = math.tanh %218 : vector<16x128xf32>
    %220 = arith.mulf %216, %194 : vector<16x128xf32>
    %221 = arith.mulf %215, %219 : vector<16x128xf32>
    %222 = arith.addf %220, %221 : vector<16x128xf32>
    %223 = math.tanh %222 : vector<16x128xf32>
    %224 = arith.mulf %217, %223 : vector<16x128xf32>
    %225 = arith.index_cast %c7_i32 : i32 to index
    %c0_66 = arith.constant 0 : index
    %c0_67 = arith.constant 0 : index
    %226 = vector.load %arg6[%225, %c0_66, %c0_67] : memref<8x16x128xf32, #tpu.memory_space<vmem>>, vector<1x16x128xf32>
    %227 = vector.shape_cast %226 : vector<1x16x128xf32> to vector<16x128xf32>
    %228 = vector.shape_cast %224 : vector<16x128xf32> to vector<1x16x128xf32>
    tpu.vector_store %arg6[%225, %c0_66, %c0_67], %228 {strides = array<i32>} : memref<8x16x128xf32, #tpu.memory_space<vmem>>, vector<1x16x128xf32>,
    %c8_i32 = arith.constant 8 : i32
    %c0_68 = arith.constant 0 : index
    %c0_69 = arith.constant 0 : index
    %229 = vector.load %arg9[%c0_68, %c0_69] : memref<16x128xf32, #tpu.memory_space<vmem>>, vector<16x128xf32>
    tpu.vector_store %arg9[%c0_68, %c0_69], %224 {strides = array<i32>} : memref<16x128xf32, #tpu.memory_space<vmem>>, vector<16x128xf32>,
    %c0_70 = arith.constant 0 : index
    %c0_71 = arith.constant 0 : index
    %230 = vector.load %arg10[%c0_70, %c0_71] : memref<16x128xf32, #tpu.memory_space<vmem>>, vector<16x128xf32>
    tpu.vector_store %arg10[%c0_70, %c0_71], %222 {strides = array<i32>} : memref<16x128xf32, #tpu.memory_space<vmem>>, vector<16x128xf32>,
    %c1_i32_72 = arith.constant 1 : i32
    %231 = arith.cmpi eq, %arg1, %c1_i32_72 : i32
    %232 = arith.extui %231 : i1 to i32
    %c0_i32_73 = arith.constant 0 : i32
    %233 = arith.cmpi ne, %232, %c0_i32_73 : i32
    scf.if %233 {
      %c0_74 = arith.constant 0 : index
      %c0_75 = arith.constant 0 : index
      %234 = vector.load %arg7[%c0_74, %c0_75] : memref<16x128xf32, #tpu.memory_space<vmem>>, vector<16x128xf32>
      tpu.vector_store %arg7[%c0_74, %c0_75], %224 {strides = array<i32>} : memref<16x128xf32, #tpu.memory_space<vmem>>, vector<16x128xf32>,
      %c0_76 = arith.constant 0 : index
      %c0_77 = arith.constant 0 : index
      %235 = vector.load %arg8[%c0_76, %c0_77] : memref<16x128xf32, #tpu.memory_space<vmem>>, vector<16x128xf32>
      tpu.vector_store %arg8[%c0_76, %c0_77], %222 {strides = array<i32>} : memref<16x128xf32, #tpu.memory_space<vmem>>, vector<16x128xf32>,
    } else {
    }
    return
  }
  func.func @transform_0(%arg0: i32, %arg1: i32) -> (i32, i32, i32) {
    %c0_i32 = arith.constant 0 : i32
    %c0_i32_0 = arith.constant 0 : i32
    return %arg1, %arg0, %c0_i32 : i32, i32, i32
  }
  func.func @transform_1(%arg0: i32, %arg1: i32) -> (i32, i32) {
    %c0_i32 = arith.constant 0 : i32
    %c0_i32_0 = arith.constant 0 : i32
    return %arg0, %c0_i32 : i32, i32
  }
  func.func @transform_2(%arg0: i32, %arg1: i32) -> (i32, i32) {
    %c0_i32 = arith.constant 0 : i32
    %c0_i32_0 = arith.constant 0 : i32
    return %arg0, %c0_i32 : i32, i32
  }
  func.func @transform_3(%arg0: i32, %arg1: i32) -> (i32, i32) {
    %c0_i32 = arith.constant 0 : i32
    %c0_i32_0 = arith.constant 0 : i32
    %c0_i32_1 = arith.constant 0 : i32
    return %c0_i32, %c0_i32_0 : i32, i32
  }
  func.func @transform_4(%arg0: i32, %arg1: i32) -> (i32, i32, i32) {
    %c0_i32 = arith.constant 0 : i32
    %c0_i32_0 = arith.constant 0 : i32
    return %arg1, %arg0, %c0_i32 : i32, i32, i32
  }
  func.func @transform_5(%arg0: i32, %arg1: i32) -> (i32, i32) {
    %c0_i32 = arith.constant 0 : i32
    %c0_i32_0 = arith.constant 0 : i32
    return %arg0, %c0_i32 : i32, i32
  }
  func.func @transform_6(%arg0: i32, %arg1: i32) -> (i32, i32) {
    %c0_i32 = arith.constant 0 : i32
    %c0_i32_0 = arith.constant 0 : i32
    return %arg0, %c0_i32 : i32, i32
  }
}

</mosaic_0001>

<bundles_post_ra>
// kernel: tpu_custom_call.1
= control target key start
LH: loop header
LB: loop body
LE: loop exit
PB: predicated region body
PF: predicated region fallthrough
CT: control target
= control target key end

     0   :  { %s5643_s0 = inlined_call_operand.hbm [shape: bf16[16,32,512], index: 0, kind: input, shape index: {}]   ;;  %s5644_s1 = inlined_call_operand.hbm [shape: f32[32,128], index: 1, kind: input, shape index: {}]   ;;  %s5645_s2 = inlined_call_operand.hbm [shape: f32[32,128], index: 2, kind: input, shape index: {}]   ;;  %s5646_s3 = inlined_call_operand.hbm [shape: bf16[128,512], index: 3, kind: input, shape index: {}]   ;;  %s5647_s4 = inlined_call_operand.hbm [shape: f32[16,32,128], index: 4, kind: output, shape index: {0}]   ;;  %s5648_s5 = inlined_call_operand.hbm [shape: f32[32,128], index: 5, kind: output, shape index: {1}]   ;;  %s5649_s6 = inlined_call_operand.hbm [shape: f32[32,128], index: 6, kind: output, shape index: {2}]  }
   0x1   :  { %5671 = sst [smem:[#allocation38_spill]] %s5643_s0 }
   0x2   :  { %5672 = sst [smem:[#allocation39_spill]] %s5646_s3 }
   0x3   :  { %5673 = sst [smem:[#allocation40_spill]] %s5647_s4 }
   0x4   :  { %5674 = sst [smem:[#allocation41_spill]] %s5648_s5 }
   0x5   :  { %5675 = sst [smem:[#allocation42_spill]] %s5649_s6 }
   0x6   :  { %12 = vsyncpa [#allocation5], 0 }
   0x7   :  { %14 = vsyncpa [#allocation5 + $0x1], 0 }
   0x8   :  { %15 = vsyncpa [#allocation8], 0 }
   0x9   :  { %17 = vsyncpa [#allocation8 + $0x1], 0 }
   0xa   :  { %18 = vsyncpa [#allocation11], 0 }
   0xb   :  { %19 = vsyncpa [#allocation6], 0 }
   0xc   :  { %21 = vsyncpa [#allocation6 + $0x1], 0 }
   0xd   :  { %22 = vsyncpa [#allocation14], 0 }
   0xe   :  { %24 = vsyncpa [#allocation14 + $0x1], 0  ;;  %s4772_s21 = smov 0   ;;  %s4774_s22 = smov 0  }
   0xf   :  { %s4776_s23 = smov 0   ;;  %s4778_s24 = smov 0  }
  0x10   :  { %s4780_s25 = smov 0   ;;  %s4782_s26 = smov 0  }
  0x11   :  { %s4784_s27 = smov 0   ;;  %s4786_s28 = smov 0  }
  0x12   :  { %s4788_s29 = smov 0   ;;  %s4790_s30 = smov 0  }
  0x13   :  { %s4792_s7 = smov 0  }
  0x14 LB: > { %5676 = sst [smem:[#allocation26_spill]] %s4682_s24  ;;  %s4828_s8 = sadd.s32 4294967295, %s4710_s7   ;;  %s4710_s7 = sphi %s4792_s7, %s30_s7   ;;  %s4706_s30 = sphi %s4790_s30, %s5734_s30   ;;  %s4702_s29 = sphi %s4788_s29, %s5725_s29   ;;  %s4698_s28 = sphi %s4786_s28, %s5733_s28   ;;  %s4694_s27 = sphi %s4784_s27, %s5732_s27   ;;  %s4690_s26 = sphi %s4782_s26, %s5723_s26   ;;  %s4686_s25 = sphi %s4780_s25, %s5731_s25   ;;  %s4682_s24 = sphi %s4778_s24, %s5730_s24   ;;  %s4678_s23 = sphi %s4776_s23, %s5729_s23   ;;  %s4674_s22 = sphi %s4774_s22, %s5728_s22   ;;  %s4670_s21 = sphi %s4772_s21, %s5727_s21  }
  0x15   : > { %5677 = sst [smem:[#allocation27_spill]] %s4690_s26  ;;  %s39_s10 = sadd.s32 1, %s4702_s29 }
  0x16   : > { %5678 = sst [smem:[#allocation28_spill]] %s4698_s28  ;;  %s42_s11 = sadd.s32 1, %s4706_s30 }
  0x17   : > { %5679 = sst [smem:[#allocation29_spill]] %s4702_s29  ;;  %p40_p0 = scmp.ge.s32.totalorder %s39_s10, 2 }
  0x18   : > { %s51_s12 = sadd.s32 1, %s4690_s26  ;;  %p58_p1 = scmp.ne.s32.totalorder %s4690_s26, %s4686_s25 }
  0x19   : > { %p59_p2 = scmp.eq.s32.totalorder %s4710_s7, 0  ;;  %s5736_s10 = smov (%p40_p0, %s39_s10), 0 }
  0x1a   : > { %5680 = sst [smem:[#allocation30_spill]] %s5736_s10  ;;  %s5738_s11 = smov (!%p40_p0, %s42_s11), %s4706_s30 }
  0x1b   : > { %s46_s13 = ssub.s32 %s4702_s29, %s5736_s10  ;;  %p4847_p3 = por %p59_p2, %p58_p1 }
  0x1c   : > { %p44_p4 = scmp.ge.s32.totalorder %s5738_s11, 2  ;;  %p5651_p5 = scmp.ne.s32.totalorder %s4686_s25, %s4682_s24 }
  0x1d   : > { %p5653_p6 = scmp.eq.s32.totalorder %s4828_s8, 0  ;;  %s77_s15 = sadd.s32 1, %s4678_s23 }
  0x1e   : > { %s5740_s11 = smov (%p44_p4, %s5738_s11), 0  ;;  %p84_p8 = scmp.ne.s32.totalorder %s4678_s23, %s4674_s22 }
  0x1f   : > { %5682 = sst [smem:[#allocation31_spill]] %s5740_s11  ;;  %p4862_p7 = por %p5653_p6, %p5651_p5 }
  0x20   : > { %s47_s17 = ssub.s32 %s4706_s30, %s5740_s11  ;;  %p90_p9 = scmp.ne.s32.totalorder %s4674_s22, %s4670_s21 }
  0x21   : > { %s5683_s16 = scalar_select %p4862_p7, 1, 0 }
  0x22   : > { %s48_s18 = sor.u32 %s47_s17, %s46_s13  ;;  %p75_p10 = scmp.eq.s32.totalorder %s47_s17, 0 }
  0x23   : > { %p49_p11 = scmp.eq.s32.totalorder %s48_s18, 0  ;;  %p4877_p12 = por %p84_p8, %p59_p2 }
  0x24   : > { %s4882_s20 = scalar_select %p75_p10, %s4678_s23, %s77_s15  }
  0x25   : > { %s5684_s19 = scalar_select %p4877_p12, 1, 0 }
  0x26   : > { %5685 = sst [smem:[#allocation32_spill]] %s4882_s20  ;;  %p4892_p13 = por %p90_p9, %p5653_p6 }
  0x27   : > { %s4885_s9 = scalar_select %p49_p11, %s4690_s26, %s51_s12  }
  0x28   : > { %s5687_s11 = scalar_select %p4892_p13, 1, 0 }
  0x29   : > { %5686 = sst [smem:[#allocation33_spill]] %s4885_s9  ;;  %p163_p0 = scmp.eq.s32.totalorder %s4828_s8, 3 }
  0x2a   : > { %s5688_s13 = sadd.s32 4294967294, %s4710_s7   ;;  %p3556_p5 = scmp.ge.s32.totalorder %s4710_s7, 1 }
  0x2b   : > { %p169_p4 = scmp.eq.s32.totalorder %s5688_s13, 3  ;;  %p4903_p2 = por %p163_p0, %p58_p1 }
  0x2c   : > { %p4910_p10 = por %p163_p0, %p84_p8  ;;  %p5693_p11 = scmp.ne.s32.totalorder %s4686_s25, %s4682_s24 }
  0x2d   : > { %s5689_s17 = scalar_select %p4903_p2, 1, 0 }
  0x2e   : > { %s5691_s15 = scalar_select %p4910_p10, 1, 0 }
  0x2f   : > { %5690 = sst [smem:[#allocation34_spill]] %s5689_s17  ;;  %p4917_p7 = por %p169_p4, %p5693_p11 }
  0x30   : > { %5692 = sst [smem:[#allocation35_spill]] %s5691_s15  ;;  %p4924_p6 = por %p169_p4, %p90_p9 }
  0x31   : > { %s5694_s12 = scalar_select %p4917_p7, 1, 0 }
  0x32   : > { %s5696_s18 = scalar_select %p4924_p6, 1, 0 }
  0x33   : > { %5695 = sst [smem:[#allocation36_spill]] %s5694_s12  ;;  %p228_p13 = scmp.lt.s32.totalorder %s4710_s7, 5 }
  0x34   : > { %5697 = sst [smem:[#allocation37_spill]] %s5696_s18  ;;  %s4712_s10 = smov [#allocation10]  }
  0x35   : > { %p4929_p1 = pnand %p3556_p5, %p228_p13  ;;  %s240_s9 = sshll.u32 %s4712_s10, 4  ;;  %s241_s9 = int_to_ptr.vmem [resolvable:$true] %s240_s9 }
  0x36   : > { %p5699_p0 = scmp.eq.s32.totalorder %s4828_s8, 0  ;;  %s4485_s20 = scalar_lea.vmem %s241_s9, 4096 }
  0x37   : > { %p3978_p8 = pneg %p4929_p1  ;;  %p4486_p7 = scmp.ne.s32.totalorder %s241_s9, %s4485_s20 }
  0x38   : > { %p4493_p2 = scmp.lt.s32.totalorder %s241_s9, %s241_s9  ;;  %p4494_p6 = scmp.lt.s32.totalorder %s4485_s20, %s4485_s20 }
  0x39   : > { %p3979_p11 = pnand %p3978_p8, %p5699_p0 }
  0x3a   : > { %p4495_p12 = por %p4494_p6, %p4493_p2 }
  0x3b   : > { %p4476_p10 = pneg %p3979_p11 }
  0x3d   : > { %p4488_p9 = pnand %p4486_p7, %p4476_p10 }
  0x3f   : > { %p4489_p4 = pneg %p4488_p9 }
  0x41   : > { %p4496_p5 = pnand %p4495_p12, %p4489_p4 }
  0x43   : > { %4499 = shalt.err (!%p4496_p5)
}
  0x44   : > { %s4713_s21 = smov 256   ;;  %s4714_s18 = smov 16  }
  0x45   : > { %s5700_s3 = sld [smem:[#allocation39_spill]]  ;;  %p3558_p13 = scmp.ge.s32.totalorder %s4710_s7, 4 }
  0x47   : > { %250 = sbr.rel (%p3558_p13) target bundleno = 121 (0x79), region = 20 }
  0x4b   : > { %3981 = dma.hbm_to_vmem [thread:$0]  (!%p3979_p11), %s5700_s3, 4096, %s241_s9, [#allocation11], %s4713_s21, %s4713_s21, %s4714_s18  }
  0x4c   : > { %s254_s10 = sand.u32 1, %s4690_s26   ;;  %s3942_s20 = sshll.u32 %s4706_s30, 3 }
  0x4d   : > { %s3559_s6 = sshll.u32 %s254_s10, 8  ;;  %s3943_s5 = sshll.u32 %s4702_s29, 7 }
  0x4e   : > { %s266_s15 = sadd.s32 %s3943_s5, %s3942_s20  ;;  %s258_s4 = scalar_lea.vmem [#allocation4], %s3559_s6 }
  0x4f   : > { %s281_s24 = sshll.u32 %s258_s4, 4  ;;  %s3564_s9 = sshll.u32 %s266_s15, 6  ;;  %s282_s24 = int_to_ptr.vmem [resolvable:$true] %s281_s24 }
  0x50   : > { %s3951_s12 = scalar_select %p4847_p3, [#allocation0], [#allocation20] }
  0x51   : > { %s4715_s18 = smov 1024   ;;  %s4716_s3 = smov 512  }
  0x52   : > { %3952 = sst [smem:[#allocation17]] (%p4847_p3), %s4715_s18  ;;  %s4717_s26 = smov 2  }
  0x53   : > { %s273_s21 = sld [smem:[%s3951_s12]]   ;;  %s4718_s5 = smov 256  }
  0x54   : > { %3953 = sst [smem:[#allocation17 + $0x1]] (%p4847_p3), %s4716_s3  ;;  %s4719_s20 = smov 16  }
  0x55   : > { %3954 = sst [smem:[#allocation17 + $0x2]] (%p4847_p3), %s4717_s26  ;;  %s255_s29 = scalar_lea.sflag [#allocation5], %s254_s10 }
  0x56   : > { %3955 = sst [smem:[#allocation17 + $0x3]] (%p4847_p3), %s4718_s5  ;;  %s4720_s3 = smov 131072  }
  0x57   : > { %s5701_s0 = sld [smem:[#allocation38_spill]]  ;;  %s304_s26 = sand.u32 1, %s4710_s7  }
  0x58   : > { %3956 = sst [smem:[#allocation17 + $0x4]] (%p4847_p3), %s4718_s5  ;;  %s306_s17 = sand.u32 1, %s4678_s23  }
  0x59   : > { %3957 = sst [smem:[#allocation17 + $0x5]] (%p4847_p3), %s4719_s20  ;;  %s3565_s12 = sshll.u32 %s273_s21, 26 }
  0x5a   : > { %s3566_s18 = sadd.s32 134217728, %s3565_s12  ;;  %s3567_s28 = sshll.u32 %s306_s17, 4 }
  0x5b   : > { %s3944_s4 = sshll.u32 %s4706_s30, 8  ;;  %s4969_s21 = scalar_lea.sflag [#allocation8], %s304_s26 }
  0x5c   : > { %s314_s5 = scalar_lea.hbm %s5644_s1, %s3944_s4 }
  0x5d   : > { %s268_s15 = scalar_lea.hbm %s5701_s0, %s3564_s9  ;;  %s308_s0 = scalar_lea.vmem [#allocation7], %s3567_s28 }
  0x5e   : > { %3958 = dma.general (%p4847_p3), %s268_s15, 4096, %s282_s24, %s255_s29, %s4720_s3, [#allocation17], %s3566_s18, 0  }
  0x5f   : > { %s315_s20 = sshll.u32 %s308_s0, 4  ;;  %p5702_p3 = scmp.ne.s32.totalorder %s5684_s19, 0  ;;  %s316_s20 = int_to_ptr.vmem [resolvable:$true] %s315_s20 }
  0x60   : > { %s4512_s10 = scalar_lea.vmem %s316_s20, 256  ;;  %s4721_s29 = smov [#allocation7]  }
  0x61   : > { %p4513_p6 = scmp.ne.s32.totalorder %s316_s20, %s4512_s10  ;;  %s4516_s14 = sshll.u32 %s4721_s29, 4  ;;  %s4517_s14 = int_to_ptr.vmem [resolvable:$false] %s4516_s14 }
  0x62   : > { %s4518_s24 = scalar_lea.vmem %s4517_s14, 512  ;;  %p4519_p2 = scmp.lt.s32.totalorder %s316_s20, %s4517_s14 }
  0x63   : > { %p4514_p7 = pnand %p4513_p6, %p5702_p3  ;;  %p4520_p10 = scmp.lt.s32.totalorder %s4518_s24, %s4512_s10 }
  0x65   : > { %p4515_p12 = pneg %p4514_p7  ;;  %p4521_p8 = por %p4520_p10, %p4519_p2 }
  0x67   : > { %p4522_p0 = pnand %p4521_p8, %p4515_p12 }
  0x69   : > { %4525 = shalt.err (!%p4522_p0)
}
  0x6a   : > { %s4722_s17 = smov 128   ;;  %s4723_s0 = smov 8  }
  0x6b   : > { %3959 = dma.hbm_to_vmem [thread:$0]  (%p5702_p3), %s314_s5, 256, %s316_s20, %s4969_s21, %s4722_s17, %s4722_s17, %s4723_s0  }
  0x6c   : > { %s335_s18 = scalar_lea.hbm %s5645_s2, %s3944_s4  ;;  %s329_s3 = scalar_lea.vmem [#allocation9], %s3567_s28 }
  0x6d   : > { %s336_s26 = sshll.u32 %s329_s3, 4  ;;  %s4724_s6 = smov [#allocation9]   ;;  %s337_s26 = int_to_ptr.vmem [resolvable:$true] %s336_s26 }
  0x6e   : > { %s4538_s9 = scalar_lea.vmem %s337_s26, 256  ;;  %s4542_s10 = sshll.u32 %s4724_s6, 4  ;;  %s4543_s10 = int_to_ptr.vmem [resolvable:$false] %s4542_s10 }
  0x6f   : > { %p4539_p11 = scmp.ne.s32.totalorder %s337_s26, %s4538_s9  ;;  %s4544_s29 = scalar_lea.vmem %s4543_s10, 512 }
  0x70   : > { %p4545_p5 = scmp.lt.s32.totalorder %s337_s26, %s4543_s10  ;;  %p4546_p13 = scmp.lt.s32.totalorder %s4544_s29, %s4538_s9 }
  0x71   : > { %p4540_p9 = pnand %p4539_p11, %p5702_p3 }
  0x72   : > { %p4547_p6 = por %p4546_p13, %p4545_p5 }
  0x73   : > { %p4541_p4 = pneg %p4540_p9 }
  0x75   : > { %p4548_p7 = pnand %p4547_p6, %p4541_p4 }
  0x77   : > { %4551 = shalt.err (!%p4548_p7)
}
  0x78   : > { %3960 = dma.hbm_to_vmem [thread:$0]  (%p5702_p3), %s335_s18, 256, %s337_s26, %s4969_s21, %s4722_s17, %s4722_s17, %s4723_s0  }
  0x79 PF: > { %348 = sbr.rel (%p4929_p1) target bundleno = 2289 (0x8f1), region = 36  ;;  %s4987_s28 = sand.u32 (!%p4929_p1), 1, %s4686_s25  }
  0x7a   : > { %s3574_s4 = sshll.u32 (!%p4929_p1), %s4987_s28, 8  ;;  %s351_s5 = scalar_lea.sflag (!%p4929_p1), [#allocation5], %s4987_s28 }
  0x7b   : > { %s4991_s20 = scalar_lea.vmem (!%p4929_p1), [#allocation4], %s3574_s4  ;;  %p5703_p12 = scmp.ne.s32.totalorder (!%p4929_p1), %s5683_s16, 0 }
  0x7e   : > { %4649 = dma.done.wait (%p5703_p12), %s351_s5, 4096  }
  0x7f   : > { %4651 = vsyncadd (%p5703_p12), %s351_s5, 4294963200  ;;  %s359_s19 = sand.u32 1, %s4828_s8   ;;  %s361_s13 = sand.u32 1, %s4674_s22  }
  0x80   : > { %s3575_s21 = sshll.u32 %s361_s13, 4  ;;  %s360_s14 = scalar_lea.sflag [#allocation8], %s359_s19 }
  0x81   : > { %s363_s24 = scalar_lea.vmem [#allocation7], %s3575_s21  ;;  %p5704_p1 = scmp.ne.s32.totalorder %s5687_s11, 0 }
  0x83   : > { %4653 = dma.done.wait (%p5704_p1), %s360_s14, 512  }
  0x84   : > { %4655 = vsyncadd (%p5704_p1), %s360_s14, 4294966784  ;;  %s372_s17 = scalar_lea.vmem [#allocation9], %s3575_s21  ;;  %p5705_p3 = scmp.eq.s32.totalorder %s4828_s8, 0 }
  0x86   : > { %4657 = dma.done.wait (%p5705_p3), [#allocation11], 4096   ;;  %p5706_p2 = pmov %p5705_p3 }
  0x87   : > { %s3578_s16 = sshll.u32 %s4987_s28, 7  ;;  %s5012_s15 = scalar_lea.vmem [#allocation13], %s3575_s21 }
  0x88   : > { %4659 = vsyncadd (%p5706_p2), [#allocation11], 4294963200  ;;  %s5010_s0 = scalar_lea.vmem [#allocation12], %s3578_s16  ;;  %s5014_s12 = scalar_lea.vmem [#allocation15], %s3575_s21 }
  0x89   : > { %p3581_p10 = scmp.ne.s32.totalorder %s4694_s27, 0 }
  0x8b   : > { %437 = sbr.rel (%p3581_p10) target bundleno = 147 (0x93), region = 56 }
  0x90   : > { %v438_v0 = vld [vmem:[%s363_s24] sm:$0xff]  ;;  %v439_v1 = vld [vmem:[%s363_s24 + $0x8] sm:$0xff] }
  0x91   : > { %v442_v2 = vld [vmem:[%s372_s17] sm:$0xff]  ;;  %440 = vst [vmem:[#allocation2] sm:$0xff] %v438_v0  ;;  %441 = vst [vmem:[#allocation2 + $0x8] sm:$0xff] %v439_v1  ;;  %v443_v3 = vld [vmem:[%s372_s17 + $0x8] sm:$0xff] }
  0x92   : > { %444 = vst [vmem:[#allocation3 + $0x8] sm:$0xff] %v442_v2  ;;  %445 = vst [vmem:[#allocation3] sm:$0xff] %v443_v3 }
  0x93 PF: > { %v5017_v4 = vld [vmem:[#allocation10 + $0xe4] ss:$16 sps:$4 sm:$0xff]   ;;  %v5019_v5 = vld [vmem:[#allocation10 + $0xe0] ss:$16 sps:$4 sm:$0xff]   ;;  %v4725_v6 = vmov 0   ;;  %v451_v52 = vld [vmem:[%s4991_s20 + $0x8] sm:$0xff] }
  0x94   : > { %687 = vmatprep.mubr.bf16.mxu0 %v4725_v6  ;;  %730 = vmatprep.mubr.bf16.mxu1 %v4725_v6  ;;  %v5024_v7 = vld [vmem:[#allocation10 + $0xc4] ss:$16 sps:$4 sm:$0xff]   ;;  %v5027_v8 = vld [vmem:[#allocation10 + $0xc0] ss:$16 sps:$4 sm:$0xff]   ;;  %v5032_v10 = vld [vmem:[#allocation10 + $0xec] ss:$16 sps:$4 sm:$0xff]   ;;  %v456_v58 = vunpack.c.l.bf16 %v451_v52  ;;  %v457_v0 = vunpack.c.h.bf16 %v451_v52 }
  0x95   : > { %655 = vmatprep.subr.bf16.mxu0 %v5017_v4  ;;  %v5030_v9 = vld [vmem:[#allocation10 + $0xa4] ss:$16 sps:$4 sm:$0xff]   ;;  %v5034_v11 = vld [vmem:[#allocation10 + $0xe8] ss:$16 sps:$4 sm:$0xff]   ;;  %v5037_v12 = vld [vmem:[#allocation10 + $0xa0] ss:$16 sps:$4 sm:$0xff]   ;;  %698 = vmatprep.subr.bf16.mxu1 %v5032_v10 }
  0x96   : > { %656 = vmatpush1.bf16.msra.mxu0 %v5019_v5  ;;  %v5041_v13 = vld [vmem:[#allocation10 + $0x84] ss:$16 sps:$4 sm:$0xff]   ;;  %699 = vmatpush1.bf16.msra.mxu1 %v5034_v11  ;;  %v5044_v14 = vld [vmem:[#allocation10 + $0xcc] ss:$16 sps:$4 sm:$0xff]   ;;  %v5046_v15 = vld [vmem:[#allocation10 + $0xc8] ss:$16 sps:$4 sm:$0xff]  }
  0x97   : > { %657 = vmatprep.subr.bf16.mxu0 %v5024_v7  ;;  %700 = vmatprep.subr.bf16.mxu1 %v5044_v14  ;;  %v5050_v16 = vld [vmem:[#allocation10 + $0x80] ss:$16 sps:$4 sm:$0xff]   ;;  %v5052_v17 = vld [vmem:[#allocation10 + $0x64] ss:$16 sps:$4 sm:$0xff]   ;;  %v5054_v18 = vld [vmem:[#allocation10 + $0xac] ss:$16 sps:$4 sm:$0xff]  }
  0x98   : > { %v5058_v19 = vld [vmem:[#allocation10 + $0xa8] ss:$16 sps:$4 sm:$0xff]   ;;  %v5061_v20 = vld [vmem:[#allocation10 + $0x8c] ss:$16 sps:$4 sm:$0xff]   ;;  %v5064_v21 = vld [vmem:[#allocation10 + $0x60] ss:$16 sps:$4 sm:$0xff]  }
  0x99   : > { %v5067_v22 = vld [vmem:[#allocation10 + $0x44] ss:$16 sps:$4 sm:$0xff]   ;;  %v5070_v23 = vld [vmem:[#allocation10 + $0x88] ss:$16 sps:$4 sm:$0xff]   ;;  %v5073_v24 = vld [vmem:[#allocation10 + $0x6c] ss:$16 sps:$4 sm:$0xff]  }
  0x9a   : > { %658 = vmatpush1.bf16.msra.mxu0 %v5027_v8  ;;  %701 = vmatpush1.bf16.msra.mxu1 %v5046_v15  ;;  %v5076_v25 = vld [vmem:[#allocation10 + $0x40] ss:$16 sps:$4 sm:$0xff]   ;;  %v5079_v26 = vld [vmem:[#allocation10 + $0x24] ss:$16 sps:$4 sm:$0xff]   ;;  %v5082_v27 = vld [vmem:[#allocation10 + $0x68] ss:$16 sps:$4 sm:$0xff]  }
  0x9b   : > { %659 = vmatprep.subr.bf16.mxu0 %v5030_v9  ;;  %702 = vmatprep.subr.bf16.mxu1 %v5054_v18  ;;  %v5084_v28 = vld [vmem:[#allocation10 + $0x20] ss:$16 sps:$4 sm:$0xff]   ;;  %v5087_v29 = vld [vmem:[#allocation10 + $0x4c] ss:$16 sps:$4 sm:$0xff]   ;;  %v5089_v30 = vld [vmem:[#allocation10 + $0x4] ss:$16 sps:$4 sm:$0xff]  }
  0x9c   : > { %v5091_v31 = vld [vmem:[#allocation10 + $0x48] ss:$16 sps:$4 sm:$0xff]   ;;  %v5094_v32 = vld [vmem:[#allocation10 + $0x2c] ss:$16 sps:$4 sm:$0xff]   ;;  %v5098_v33 = vld [vmem:[#allocation10] ss:$16 sps:$4 sm:$0xff]  }
  0x9d   : > { %v446_v34 = vld [vmem:[#allocation2] sm:$0xff]  ;;  %v447_v35 = vld [vmem:[#allocation2 + $0x8] sm:$0xff]  ;;  %v452_v42 = vld [vmem:[%s4991_s20 + $0x10] sm:$0xff]  ;;  %p3928_p8 = scmp.ne.s32.totalorder %s4694_s27, 1 }
  0x9e   : > { %660 = vmatpush1.bf16.msra.mxu0 %v5037_v12  ;;  %703 = vmatpush1.bf16.msra.mxu1 %v5058_v19  ;;  %v5101_v36 = vld [vmem:[#allocation10 + $0x28] ss:$16 sps:$4 sm:$0xff]   ;;  %v5104_v37 = vld [vmem:[#allocation10 + $0xc] ss:$16 sps:$4 sm:$0xff]   ;;  %v462_v38 = vpack.c.bf16 %v447_v35, %v446_v34  ;;  %v450_v40 = vld [vmem:[%s4991_s20] sm:$0xff]  ;;  %v458_v46 = vunpack.c.l.bf16 %v452_v42  ;;  %v459_v50 = vunpack.c.h.bf16 %v452_v42 }
  0x9f   : > { %661 = vmatprep.subr.bf16.mxu0 %v5041_v13  ;;  %704 = vmatprep.subr.bf16.mxu1 %v5061_v20  ;;  %v5109_v39 = vld [vmem:[#allocation10 + $0x8] ss:$16 sps:$4 sm:$0xff]   ;;  %v454_v41 = vunpack.c.l.bf16 %v450_v40  ;;  %v455_v43 = vunpack.c.h.bf16 %v450_v40 }
  0xa0   : > { %v453_v61 = vld [vmem:[%s4991_s20 + $0x18] sm:$0xff] }
  0xa1   : > { %v460_v1 = vunpack.c.l.bf16 %v453_v61  ;;  %v461_v40 = vunpack.c.h.bf16 %v453_v61  ;;  %v449_v61 = vld [vmem:[#allocation3] sm:$0xff] }
  0xa2   : > { %662 = vmatpush1.bf16.msra.mxu0 %v5050_v16  ;;  %705 = vmatpush1.bf16.msra.mxu1 %v5070_v23 }
  0xa3   : > { %663 = vmatprep.subr.bf16.mxu0 %v5052_v17  ;;  %706 = vmatprep.subr.bf16.mxu1 %v5073_v24 }
  0xa6   : > { %664 = vmatpush1.bf16.msra.mxu0 %v5064_v21  ;;  %707 = vmatpush1.bf16.msra.mxu1 %v5082_v27 }
  0xa7   : > { %665 = vmatprep.subr.bf16.mxu0 %v5067_v22  ;;  %708 = vmatprep.subr.bf16.mxu1 %v5087_v29 }
  0xaa   : > { %666 = vmatpush1.bf16.msra.mxu0 %v5076_v25  ;;  %709 = vmatpush1.bf16.msra.mxu1 %v5091_v31 }
  0xab   : > { %667 = vmatprep.subr.bf16.mxu0 %v5079_v26  ;;  %710 = vmatprep.subr.bf16.mxu1 %v5094_v32 }
  0xae   : > { %668 = vmatpush1.bf16.msra.mxu0 %v5084_v28  ;;  %711 = vmatpush1.bf16.msra.mxu1 %v5101_v36 }
  0xaf   : > { %669 = vmatprep.subr.bf16.mxu0 %v5089_v30  ;;  %712 = vmatprep.subr.bf16.mxu1 %v5104_v37 }
  0xb2   : > { %670 = vmatpush1.bf16.msra.mxu0 %v5098_v33  ;;  %713 = vmatpush1.bf16.msra.mxu1 %v5109_v39 }
  0xb3   : > { %1005 = vmatprep.subr.bf16.mxu0 %v5017_v4  ;;  %1048 = vmatprep.subr.bf16.mxu1 %v5032_v10 }
  0xb5   : > { %688 = vmatmul.mubr.bf16.vlgmr.msra.gmra.mxu0 %v462_v38  ;;  %731 = vmatmul.mubr.bf16.vlgmr.msra.gmra.mxu1 %v462_v38 }
  0xb6   : > { %1006 = vmatpush1.bf16.msra.mxu0 %v5019_v5  ;;  %1037 = vmatprep.mubr.bf16.mxu0 %v4725_v6 }
  0xb7   : > { %1007 = vmatprep.subr.bf16.mxu0 %v5024_v7  ;;  %1049 = vmatpush1.bf16.msra.mxu1 %v5034_v11 }
  0xb8   : > { %1050 = vmatprep.subr.bf16.mxu1 %v5044_v14  ;;  %1080 = vmatprep.mubr.bf16.mxu1 %v4725_v6 }
  0xba   : > { %1008 = vmatpush1.bf16.msra.mxu0 %v5027_v8 }
  0xbb   : > { %1009 = vmatprep.subr.bf16.mxu0 %v5030_v9  ;;  %1051 = vmatpush1.bf16.msra.mxu1 %v5046_v15 }
  0xbc   : > { %1052 = vmatprep.subr.bf16.mxu1 %v5054_v18 }
  0xbe   : > { %1010 = vmatpush1.bf16.msra.mxu0 %v5037_v12 }
  0xbf   : > { %1011 = vmatprep.subr.bf16.mxu0 %v5041_v13  ;;  %1053 = vmatpush1.bf16.msra.mxu1 %v5058_v19 }
  0xc0   : > { %1054 = vmatprep.subr.bf16.mxu1 %v5061_v20 }
  0xc2   : > { %1012 = vmatpush1.bf16.msra.mxu0 %v5050_v16 }
  0xc3   : > { %1013 = vmatprep.subr.bf16.mxu0 %v5052_v17  ;;  %1055 = vmatpush1.bf16.msra.mxu1 %v5070_v23 }
  0xc4   : > { %1056 = vmatprep.subr.bf16.mxu1 %v5073_v24 }
  0xc6   : > { %1014 = vmatpush1.bf16.msra.mxu0 %v5064_v21 }
  0xc7   : > { %1015 = vmatprep.subr.bf16.mxu0 %v5067_v22  ;;  %1057 = vmatpush1.bf16.msra.mxu1 %v5082_v27 }
  0xc8   : > { %1058 = vmatprep.subr.bf16.mxu1 %v5087_v29 }
  0xca   : > { %1016 = vmatpush1.bf16.msra.mxu0 %v5076_v25 }
  0xcb   : > { %1017 = vmatprep.subr.bf16.mxu0 %v5079_v26  ;;  %1059 = vmatpush1.bf16.msra.mxu1 %v5091_v31 }
  0xcc   : > { %1060 = vmatprep.subr.bf16.mxu1 %v5094_v32 }
  0xce   : > { %1018 = vmatpush1.bf16.msra.mxu0 %v5084_v28 }
  0xcf   : > { %1019 = vmatprep.subr.bf16.mxu0 %v5089_v30  ;;  %1061 = vmatpush1.bf16.msra.mxu1 %v5101_v36 }
  0xd0   : > { %1062 = vmatprep.subr.bf16.mxu1 %v5104_v37 }
  0xd2   : > { %1020 = vmatpush1.bf16.msra.mxu0 %v5098_v33 }
  0xd3   : > { %1356 = vmatprep.subr.bf16.mxu0 %v5017_v4  ;;  %1063 = vmatpush1.bf16.msra.mxu1 %v5109_v39 }
  0xd4   : > { %1399 = vmatprep.subr.bf16.mxu1 %v5032_v10 }
 0x175   : > { %v689_v44 = vpop.f32.mrf.mxu0  ;;  %v732_v59 = vpop.f32.mrf.mxu1 }
 0x176   : > { %v741_v45 = vadd.f32 %v689_v44, %v454_v41  ;;  %v743_v62 = vadd.f32 %v732_v59, %v456_v58 }
 0x177   : > { %v691_v47 = vpop.f32.mrf.mxu0  ;;  %v734_v63 = vpop.f32.mrf.mxu1 }
 0x178   : > { %v3614_v48 = vmul.f32 -1.442695, %v741_v45  ;;  %v742_v49 = vadd.f32 %v691_v47, %v455_v43  ;;  %v3616_v2 = vmul.f32 -1.442695, %v743_v62  ;;  %v744_v34 = vadd.f32 %v734_v63, %v457_v0 }
 0x179   : > { %v693_v51 = vpop.f32.mrf.mxu0  ;;  %v736_v3 = vpop.f32.mrf.mxu1 }
 0x17a   : > { %4218 = vpow2.f32 %v3614_v48  ;;  %v3615_v53 = vmul.f32 -1.442695, %v742_v49  ;;  %v745_v54 = vadd.f32 %v693_v51, %v458_v46  ;;  %v747_v35 = vadd.f32 %v736_v3, %v460_v1 }
 0x17b   : > { %v695_v55 = vpop.f32.mrf.mxu0  ;;  %v738_v42 = vpop.f32.mrf.mxu1 }
 0x17c   : > { %4220 = vpow2.f32 %v3615_v53  ;;  %v3617_v56 = vmul.f32 -1.442695, %v745_v54  ;;  %v746_v57 = vadd.f32 %v695_v55, %v459_v50  ;;  %v3619_v44 = vmul.f32 -1.442695, %v747_v35  ;;  %v448_v54 = vld [vmem:[#allocation3 + $0x8] sm:$0xff] }
 0x17d   : > { %v748_v47 = vadd.f32 %v738_v42, %v461_v40 }
 0x17e   : > { %4222 = vpow2.f32 %v3617_v56  ;;  %v3618_v60 = vmul.f32 -1.442695, %v746_v57 }
 0x180   : > { %4224 = vpow2.f32 %v3618_v60 }
 0x181   : > { %4226 = vpow2.f32 %v3616_v2 }
 0x182   : > { %4228 = vtanh.f32 %v744_v34 }
 0x187   : > { %v4219_v38 = vpop.eup %4218 }
 0x188   : > { %v767_v41 = vadd.f32 1.0, %v4219_v38 }
 0x189   : > { %v4221_v43 = vpop.eup %4220 }
 0x18a   : > { %4230 = vrcp.f32 %v767_v41  ;;  %v768_v45 = vadd.f32 1.0, %v4221_v43 }
 0x18b   : > { %v4223_v46 = vpop.eup %4222 }
 0x18c   : > { %4232 = vrcp.f32 %v768_v45  ;;  %v770_v48 = vadd.f32 1.0, %v4223_v46  ;;  %v3621_v45 = vld [vmem:[%s4991_s20 + $0x28] sm:$0xff] }
 0x18d   : > { %v4225_v49 = vpop.eup %4224  ;;  %4234 = vpow2.f32 %v3619_v44 }
 0x18e   : > { %4236 = vrcp.f32 %v770_v48  ;;  %v771_v50 = vadd.f32 1.0, %v4225_v49  ;;  %v4227_v51 = vpop.eup %4226 }
 0x18f   : > { %4238 = vtanh.f32 %v748_v47  ;;  %v4229_v52 = vpop.eup %4228  ;;  %v769_v56 = vadd.f32 1.0, %v4227_v51 }
 0x190   : > { %4240 = vrcp.f32 %v771_v50  ;;  %v806_v50 = vunpack.c.l.bf16 %v3621_v45 }
 0x191   : > { %4242 = vrcp.f32 %v769_v56 }
 0x197   : > { %v4231_v53 = vpop.eup %4230 }
 0x198   : > { %v789_v59 = vmul.f32 %v4231_v53, %v4229_v52  ;;  %v3623_v52 = vld [vmem:[%s4991_s20 + $0x38] sm:$0xff] }
 0x199   : > { %v4233_v55 = vpop.eup %4232 }
 0x19a   : > { %v4235_v57 = vpop.eup %4234  ;;  %v787_v58 = vmul.f32 %v4233_v55, %v448_v54  ;;  %v810_v55 = vunpack.c.l.bf16 %v3623_v52 }
 0x19b   : > { %v4237_v60 = vpop.eup %4236  ;;  %v772_v1 = vadd.f32 1.0, %v4235_v57  ;;  %v807_v57 = vunpack.c.h.bf16 %v3621_v45 }
 0x19c   : > { %v4239_v62 = vpop.eup %4238  ;;  %v5155_v63 = vadd.f32 %v789_v59, %v787_v58 }
 0x19d   : > { %v4241_v0 = vpop.eup %4240  ;;  %v790_v3 = vmul.f32 %v4239_v62, %v4237_v60  ;;  %v811_v62 = vunpack.c.h.bf16 %v3623_v52 }
 0x19e   : > { %4244 = vtanh.f32 %v5155_v63  ;;  %v788_v2 = vmul.f32 %v4241_v0, %v449_v61  ;;  %v4243_v35 = vpop.eup %4242 }
 0x19f   : > { %4246 = vrcp.f32 %v772_v1 }
 0x1a0   : > { %v5158_v34 = vadd.f32 %v790_v3, %v788_v2 }
 0x1a2   : > { %4248 = vtanh.f32 %v5158_v34 }
 0x1ab   : > { %v4245_v38 = vpop.eup %4244 }
 0x1ac   : > { %v795_v40 = vmul.f32 %v4245_v38, %v4243_v35  ;;  %v4247_v41 = vpop.eup %4246 }
 0x1ae   : > { %797 = vst [vmem:[%s5010_s0] sm:$0xff] %v795_v40 }
 0x1af   : > { %v4249_v42 = vpop.eup %4248 }
 0x1b0   : > { %v796_v43 = vmul.f32 %v4249_v42, %v4247_v41 }
 0x1b2   : > { %798 = vst [vmem:[%s5010_s0 + $0x8] sm:$0xff] %v796_v43  ;;  %v812_v44 = vpack.c.bf16 %v796_v43, %v795_v40 }
 0x1b4   : > { %1038 = vmatmul.mubr.bf16.vlgmr.msra.gmra.mxu0 %v812_v44  ;;  %1081 = vmatmul.mubr.bf16.vlgmr.msra.gmra.mxu1 %v812_v44 }
 0x1b5   : > { %1357 = vmatpush1.bf16.msra.mxu0 %v5019_v5  ;;  %1400 = vmatpush1.bf16.msra.mxu1 %v5034_v11 }
 0x1b6   : > { %1358 = vmatprep.subr.bf16.mxu0 %v5024_v7  ;;  %1401 = vmatprep.subr.bf16.mxu1 %v5044_v14 }
 0x1b7   : > { %1388 = vmatprep.mubr.bf16.mxu0 %v4725_v6  ;;  %1431 = vmatprep.mubr.bf16.mxu1 %v4725_v6 }
 0x1b9   : > { %1359 = vmatpush1.bf16.msra.mxu0 %v5027_v8  ;;  %1402 = vmatpush1.bf16.msra.mxu1 %v5046_v15 }
 0x1ba   : > { %1360 = vmatprep.subr.bf16.mxu0 %v5030_v9  ;;  %1403 = vmatprep.subr.bf16.mxu1 %v5054_v18  ;;  %v3620_v9 = vld [vmem:[%s4991_s20 + $0x20] sm:$0xff] }
 0x1bd   : > { %1361 = vmatpush1.bf16.msra.mxu0 %v5037_v12  ;;  %1404 = vmatpush1.bf16.msra.mxu1 %v5058_v19  ;;  %v804_v12 = vunpack.c.l.bf16 %v3620_v9 }
 0x1be   : > { %1362 = vmatprep.subr.bf16.mxu0 %v5041_v13  ;;  %1405 = vmatprep.subr.bf16.mxu1 %v5061_v20  ;;  %v3622_v13 = vld [vmem:[%s4991_s20 + $0x30] sm:$0xff] }
 0x1c1   : > { %1363 = vmatpush1.bf16.msra.mxu0 %v5050_v16  ;;  %1406 = vmatpush1.bf16.msra.mxu1 %v5070_v23  ;;  %v805_v16 = vunpack.c.h.bf16 %v3620_v9 }
 0x1c2   : > { %1364 = vmatprep.subr.bf16.mxu0 %v5052_v17  ;;  %1407 = vmatprep.subr.bf16.mxu1 %v5073_v24 }
 0x1c5   : > { %1365 = vmatpush1.bf16.msra.mxu0 %v5064_v21  ;;  %1408 = vmatpush1.bf16.msra.mxu1 %v5082_v27 }
 0x1c6   : > { %1366 = vmatprep.subr.bf16.mxu0 %v5067_v22  ;;  %1409 = vmatprep.subr.bf16.mxu1 %v5087_v29  ;;  %v808_v22 = vunpack.c.l.bf16 %v3622_v13 }
 0x1c9   : > { %1367 = vmatpush1.bf16.msra.mxu0 %v5076_v25  ;;  %1410 = vmatpush1.bf16.msra.mxu1 %v5091_v31 }
 0x1ca   : > { %1368 = vmatprep.subr.bf16.mxu0 %v5079_v26  ;;  %1411 = vmatprep.subr.bf16.mxu1 %v5094_v32 }
 0x1cd   : > { %1369 = vmatpush1.bf16.msra.mxu0 %v5084_v28  ;;  %1412 = vmatpush1.bf16.msra.mxu1 %v5101_v36 }
 0x1ce   : > { %1370 = vmatprep.subr.bf16.mxu0 %v5089_v30  ;;  %1413 = vmatprep.subr.bf16.mxu1 %v5104_v37  ;;  %v809_v30 = vunpack.c.h.bf16 %v3622_v13 }
 0x1d1   : > { %1371 = vmatpush1.bf16.msra.mxu0 %v5098_v33  ;;  %1414 = vmatpush1.bf16.msra.mxu1 %v5109_v39 }
 0x1d2   : > { %1707 = vmatprep.subr.bf16.mxu0 %v5017_v4  ;;  %1750 = vmatprep.subr.bf16.mxu1 %v5032_v10 }
 0x274   : > { %v1039_v17 = vpop.f32.mrf.mxu0  ;;  %v1082_v46 = vpop.f32.mrf.mxu1 }
 0x275   : > { %v1091_v21 = vadd.f32 %v1039_v17, %v804_v12  ;;  %v1093_v54 = vadd.f32 %v1082_v46, %v806_v50 }
 0x276   : > { %v1041_v25 = vpop.f32.mrf.mxu0  ;;  %v1084_v51 = vpop.f32.mrf.mxu1 }
 0x277   : > { %v3656_v26 = vmul.f32 -1.442695, %v1091_v21  ;;  %v1092_v28 = vadd.f32 %v1041_v25, %v805_v16  ;;  %v3658_v58 = vmul.f32 -1.442695, %v1093_v54  ;;  %v1094_v61 = vadd.f32 %v1084_v51, %v807_v57  ;;  %v3665_v57 = vld [vmem:[%s4991_s20 + $0x48] sm:$0xff] }
 0x278   : > { %v1043_v33 = vpop.f32.mrf.mxu0  ;;  %v1086_v56 = vpop.f32.mrf.mxu1 }
 0x279   : > { %4250 = vpow2.f32 %v3656_v26  ;;  %v3657_v47 = vmul.f32 -1.442695, %v1092_v28  ;;  %v1095_v4 = vadd.f32 %v1043_v33, %v808_v22  ;;  %v1097_v59 = vadd.f32 %v1086_v56, %v810_v55 }
 0x27a   : > { %v1045_v48 = vpop.f32.mrf.mxu0  ;;  %v1088_v1 = vpop.f32.mrf.mxu1 }
 0x27b   : > { %4252 = vpow2.f32 %v3657_v47  ;;  %v3659_v10 = vmul.f32 -1.442695, %v1095_v4  ;;  %v1096_v49 = vadd.f32 %v1045_v48, %v809_v30  ;;  %v3661_v3 = vmul.f32 -1.442695, %v1097_v59 }
 0x27c   : > { %v1098_v40 = vadd.f32 %v1088_v1, %v811_v62  ;;  %v1157_v1 = vunpack.c.l.bf16 %v3665_v57 }
 0x27d   : > { %4254 = vpow2.f32 %v3659_v10  ;;  %v3660_v53 = vmul.f32 -1.442695, %v1096_v49 }
 0x27f   : > { %4256 = vpow2.f32 %v3660_v53 }
 0x280   : > { %4258 = vpow2.f32 %v3658_v58 }
 0x286   : > { %v4251_v60 = vpop.eup %4250 }
 0x287   : > { %v1117_v0 = vadd.f32 1.0, %v4251_v60 }
 0x288   : > { %v4253_v2 = vpop.eup %4252 }
 0x289   : > { %4260 = vrcp.f32 %v1117_v0  ;;  %v1118_v35 = vadd.f32 1.0, %v4253_v2 }
 0x28a   : > { %v4255_v38 = vpop.eup %4254  ;;  %4262 = vtanh.f32 %v1094_v61 }
 0x28b   : > { %4264 = vrcp.f32 %v1118_v35  ;;  %v1120_v41 = vadd.f32 1.0, %v4255_v38 }
 0x28c   : > { %v4257_v42 = vpop.eup %4256  ;;  %4266 = vpow2.f32 %v3661_v3  ;;  %v3667_v3 = vld [vmem:[%s4991_s20 + $0x58] sm:$0xff] }
 0x28d   : > { %4268 = vrcp.f32 %v1120_v41  ;;  %v1121_v43 = vadd.f32 1.0, %v4257_v42  ;;  %v4259_v44 = vpop.eup %4258  ;;  %v1158_v42 = vunpack.c.h.bf16 %v3665_v57 }
 0x28e   : > { %4270 = vtanh.f32 %v1098_v40  ;;  %v1119_v16 = vadd.f32 1.0, %v4259_v44  ;;  %v1161_v40 = vunpack.c.l.bf16 %v3667_v3 }
 0x28f   : > { %4272 = vrcp.f32 %v1121_v43 }
 0x290   : > { %4274 = vrcp.f32 %v1119_v16 }
 0x296   : > { %v4261_v9 = vpop.eup %4260 }
 0x297   : > { %v4263_v12 = vpop.eup %4262 }
 0x298   : > { %v4265_v13 = vpop.eup %4264  ;;  %v1139_v22 = vmul.f32 %v4263_v12, %v4261_v9 }
 0x299   : > { %v4267_v17 = vpop.eup %4266  ;;  %v1137_v21 = vmul.f32 %v4265_v13, %v5155_v63  ;;  %v1162_v13 = vunpack.c.h.bf16 %v3667_v3  ;;  %v5301_v3 = vld [vmem:[#allocation10 + $0xc8] ss:$16 sps:$4 sm:$0xff]  }
 0x29a   : > { %v4269_v25 = vpop.eup %4268  ;;  %v1122_v33 = vadd.f32 1.0, %v4267_v17 }
 0x29b   : > { %v4271_v26 = vpop.eup %4270  ;;  %v5202_v28 = vadd.f32 %v1139_v22, %v1137_v21 }
 0x29c   : > { %v4273_v30 = vpop.eup %4272  ;;  %v1140_v46 = vmul.f32 %v4271_v26, %v4269_v25 }
 0x29d   : > { %4276 = vtanh.f32 %v5202_v28  ;;  %v1138_v45 = vmul.f32 %v4273_v30, %v5158_v34  ;;  %v4275_v63 = vpop.eup %4274 }
 0x29e   : > { %4278 = vrcp.f32 %v1122_v33 }
 0x29f   : > { %v5206_v47 = vadd.f32 %v1140_v46, %v1138_v45 }
 0x2a1   : > { %4280 = vtanh.f32 %v5206_v47 }
 0x2aa   : > { %v4277_v4 = vpop.eup %4276 }
 0x2ab   : > { %v1145_v48 = vmul.f32 %v4277_v4, %v4275_v63  ;;  %v4279_v10 = vpop.eup %4278 }
 0x2ad   : > { %3662 = vst [vmem:[%s5010_s0 + $0x10] sm:$0xff] %v1145_v48 }
 0x2ae   : > { %v4281_v49 = vpop.eup %4280 }
 0x2af   : > { %v1146_v50 = vmul.f32 %v4281_v49, %v4279_v10 }
 0x2b1   : > { %3663 = vst [vmem:[%s5010_s0 + $0x18] sm:$0xff] %v1146_v50  ;;  %v1163_v51 = vpack.c.bf16 %v1146_v50, %v1145_v48 }
 0x2b3   : > { %1389 = vmatmul.mubr.bf16.vlgmr.msra.gmra.mxu0 %v1163_v51  ;;  %1432 = vmatmul.mubr.bf16.vlgmr.msra.gmra.mxu1 %v1163_v51 }
 0x2b4   : > { %1708 = vmatpush1.bf16.msra.mxu0 %v5019_v5  ;;  %1751 = vmatpush1.bf16.msra.mxu1 %v5034_v11  ;;  %v5231_v5 = vld [vmem:[#allocation10 + $0xa4] ss:$16 sps:$4 sm:$0xff]   ;;  %v5239_v11 = vld [vmem:[#allocation10 + $0x80] ss:$16 sps:$4 sm:$0xff]  }
 0x2b5   : > { %1709 = vmatprep.subr.bf16.mxu0 %v5024_v7  ;;  %1752 = vmatprep.subr.bf16.mxu1 %v5044_v14  ;;  %v5233_v7 = vld [vmem:[#allocation10 + $0xa0] ss:$16 sps:$4 sm:$0xff]   ;;  %v5241_v14 = vld [vmem:[#allocation10 + $0x64] ss:$16 sps:$4 sm:$0xff]  }
 0x2b6   : > { %1739 = vmatprep.mubr.bf16.mxu0 %v4725_v6  ;;  %1782 = vmatprep.mubr.bf16.mxu1 %v4725_v6 }
 0x2b8   : > { %1710 = vmatpush1.bf16.msra.mxu0 %v5027_v8  ;;  %1753 = vmatpush1.bf16.msra.mxu1 %v5046_v15  ;;  %v5237_v8 = vld [vmem:[#allocation10 + $0x84] ss:$16 sps:$4 sm:$0xff]   ;;  %v5245_v15 = vld [vmem:[#allocation10 + $0x60] ss:$16 sps:$4 sm:$0xff]  }
 0x2b9   : > { %1754 = vmatprep.subr.bf16.mxu1 %v5054_v18  ;;  %1711 = vmatprep.subr.bf16.mxu0 %v5231_v5  ;;  %v5248_v18 = vld [vmem:[#allocation10 + $0x44] ss:$16 sps:$4 sm:$0xff]  }
 0x2bc   : > { %1755 = vmatpush1.bf16.msra.mxu1 %v5058_v19  ;;  %1712 = vmatpush1.bf16.msra.mxu0 %v5233_v7  ;;  %v5251_v19 = vld [vmem:[#allocation10 + $0x40] ss:$16 sps:$4 sm:$0xff]  }
 0x2bd   : > { %1756 = vmatprep.subr.bf16.mxu1 %v5061_v20  ;;  %1713 = vmatprep.subr.bf16.mxu0 %v5237_v8  ;;  %v5254_v20 = vld [vmem:[#allocation10 + $0x24] ss:$16 sps:$4 sm:$0xff]  }
 0x2c0   : > { %1757 = vmatpush1.bf16.msra.mxu1 %v5070_v23  ;;  %1714 = vmatpush1.bf16.msra.mxu0 %v5239_v11  ;;  %v5257_v23 = vld [vmem:[#allocation10 + $0x20] ss:$16 sps:$4 sm:$0xff]  }
 0x2c1   : > { %1758 = vmatprep.subr.bf16.mxu1 %v5073_v24  ;;  %1715 = vmatprep.subr.bf16.mxu0 %v5241_v14  ;;  %v5260_v24 = vld [vmem:[#allocation10 + $0x4] ss:$16 sps:$4 sm:$0xff]  }
 0x2c4   : > { %1759 = vmatpush1.bf16.msra.mxu1 %v5082_v27  ;;  %1716 = vmatpush1.bf16.msra.mxu0 %v5245_v15  ;;  %v5263_v27 = vld [vmem:[#allocation10] ss:$16 sps:$4 sm:$0xff]  }
 0x2c5   : > { %1760 = vmatprep.subr.bf16.mxu1 %v5087_v29  ;;  %1717 = vmatprep.subr.bf16.mxu0 %v5248_v18  ;;  %v3664_v29 = vld [vmem:[%s4991_s20 + $0x40] sm:$0xff] }
 0x2c8   : > { %1761 = vmatpush1.bf16.msra.mxu1 %v5091_v31  ;;  %1718 = vmatpush1.bf16.msra.mxu0 %v5251_v19  ;;  %v1155_v31 = vunpack.c.l.bf16 %v3664_v29 }
 0x2c9   : > { %1762 = vmatprep.subr.bf16.mxu1 %v5094_v32  ;;  %1719 = vmatprep.subr.bf16.mxu0 %v5254_v20  ;;  %v3666_v32 = vld [vmem:[%s4991_s20 + $0x50] sm:$0xff] }
 0x2ca   : > { %v1159_v34 = vunpack.c.l.bf16 %v3666_v32  ;;  %v1160_v55 = vunpack.c.h.bf16 %v3666_v32 }
 0x2cc   : > { %1763 = vmatpush1.bf16.msra.mxu1 %v5101_v36  ;;  %1720 = vmatpush1.bf16.msra.mxu0 %v5257_v23  ;;  %v1156_v36 = vunpack.c.h.bf16 %v3664_v29 }
 0x2cd   : > { %1764 = vmatprep.subr.bf16.mxu1 %v5104_v37  ;;  %1721 = vmatprep.subr.bf16.mxu0 %v5260_v24 }
 0x2d0   : > { %1765 = vmatpush1.bf16.msra.mxu1 %v5109_v39  ;;  %1722 = vmatpush1.bf16.msra.mxu0 %v5263_v27 }
 0x373   : > { %v1390_v37 = vpop.f32.mrf.mxu0  ;;  %v1433_v58 = vpop.f32.mrf.mxu1 }
 0x374   : > { %v1442_v39 = vadd.f32 %v1390_v37, %v1155_v31  ;;  %v1444_v38 = vadd.f32 %v1433_v58, %v1157_v1  ;;  %v5297_v1 = vld [vmem:[#allocation10 + $0xcc] ss:$16 sps:$4 sm:$0xff]  }
 0x375   : > { %v1392_v52 = vpop.f32.mrf.mxu0  ;;  %v1435_v2 = vpop.f32.mrf.mxu1 }
 0x376   : > { %v3700_v53 = vmul.f32 -1.442695, %v1442_v39  ;;  %v1443_v54 = vadd.f32 %v1392_v52, %v1156_v36  ;;  %v3702_v43 = vmul.f32 -1.442695, %v1444_v38  ;;  %v1445_v12 = vadd.f32 %v1435_v2, %v1158_v42  ;;  %v5299_v2 = vld [vmem:[#allocation10 + $0xc0] ss:$16 sps:$4 sm:$0xff]  }
 0x377   : > { %v1394_v56 = vpop.f32.mrf.mxu0  ;;  %v1437_v41 = vpop.f32.mrf.mxu1  ;;  %v5310_v38 = vld [vmem:[#allocation10 + $0xa8] ss:$16 sps:$4 sm:$0xff]   ;;  %v5320_v42 = vld [vmem:[#allocation10 + $0x6c] ss:$16 sps:$4 sm:$0xff]  }
 0x378   : > { %4282 = vpow2.f32 %v3700_v53  ;;  %v3701_v59 = vmul.f32 -1.442695, %v1443_v54  ;;  %v1446_v60 = vadd.f32 %v1394_v56, %v1159_v34  ;;  %v1448_v44 = vadd.f32 %v1437_v41, %v1161_v40  ;;  %v5316_v40 = vld [vmem:[#allocation10 + $0x8c] ss:$16 sps:$4 sm:$0xff]   ;;  %v5318_v41 = vld [vmem:[#allocation10 + $0x88] ss:$16 sps:$4 sm:$0xff]  }
 0x379   : > { %v1396_v61 = vpop.f32.mrf.mxu0  ;;  %v1439_v17 = vpop.f32.mrf.mxu1 }
 0x37a   : > { %4284 = vpow2.f32 %v3701_v59  ;;  %v3703_v62 = vmul.f32 -1.442695, %v1446_v60  ;;  %v1447_v0 = vadd.f32 %v1396_v61, %v1160_v55  ;;  %v3705_v22 = vmul.f32 -1.442695, %v1448_v44  ;;  %v5285_v60 = vld [vmem:[#allocation10 + $0xec] ss:$16 sps:$4 sm:$0xff]  }
 0x37b   : > { %v1449_v30 = vadd.f32 %v1439_v17, %v1162_v13  ;;  %v5287_v61 = vld [vmem:[#allocation10 + $0xe0] ss:$16 sps:$4 sm:$0xff]   ;;  %2101 = vmatprep.subr.bf16.mxu1 %v5285_v60  ;;  %v5329_v44 = vld [vmem:[#allocation10 + $0x4c] ss:$16 sps:$4 sm:$0xff]   ;;  %v5341_v13 = vld [vmem:[#allocation10 + $0x28] ss:$16 sps:$4 sm:$0xff]  }
 0x37c   : > { %4286 = vpow2.f32 %v3703_v62  ;;  %v3704_v35 = vmul.f32 -1.442695, %v1447_v0  ;;  %v5289_v62 = vld [vmem:[#allocation10 + $0xe8] ss:$16 sps:$4 sm:$0xff]   ;;  %v5295_v0 = vld [vmem:[#allocation10 + $0xc4] ss:$16 sps:$4 sm:$0xff]  }
 0x37d   : > { %v5349_v17 = vld [vmem:[#allocation10 + $0x8] ss:$16 sps:$4 sm:$0xff]  }
 0x37e   : > { %4288 = vpow2.f32 %v3704_v35  ;;  %v5308_v35 = vld [vmem:[#allocation10 + $0xac] ss:$16 sps:$4 sm:$0xff]  }
 0x37f   : > { %4290 = vpow2.f32 %v3702_v43  ;;  %v5325_v43 = vld [vmem:[#allocation10 + $0x68] ss:$16 sps:$4 sm:$0xff]  }
 0x385   : > { %v4283_v9 = vpop.eup %4282 }
 0x386   : > { %v1468_v16 = vadd.f32 1.0, %v4283_v9  ;;  %v5333_v9 = vld [vmem:[#allocation10 + $0x48] ss:$16 sps:$4 sm:$0xff]  }
 0x387   : > { %v4285_v21 = vpop.eup %4284 }
 0x388   : > { %4292 = vrcp.f32 %v1468_v16  ;;  %v1469_v25 = vadd.f32 1.0, %v4285_v21  ;;  %v5345_v16 = vld [vmem:[#allocation10 + $0xc] ss:$16 sps:$4 sm:$0xff]   ;;  %v3708_v21 = vld [vmem:[%s4991_s20 + $0x60] sm:$0xff] }
 0x389   : > { %v4287_v26 = vpop.eup %4286  ;;  %4294 = vtanh.f32 %v1445_v12  ;;  %v5337_v12 = vld [vmem:[#allocation10 + $0x2c] ss:$16 sps:$4 sm:$0xff]  }
 0x38a   : > { %4296 = vrcp.f32 %v1469_v25  ;;  %v1471_v33 = vadd.f32 1.0, %v4287_v26  ;;  %v3710_v25 = vld [vmem:[%s4991_s20 + $0x70] sm:$0xff]  ;;  %v1507_v26 = vunpack.c.h.bf16 %v3708_v21 }
 0x38b   : > { %v4289_v45 = vpop.eup %4288  ;;  %4298 = vpow2.f32 %v3705_v22  ;;  %v1506_v22 = vunpack.c.l.bf16 %v3708_v21 }
 0x38c   : > { %4300 = vrcp.f32 %v1471_v33  ;;  %v1472_v46 = vadd.f32 1.0, %v4289_v45  ;;  %v4291_v63 = vpop.eup %4290  ;;  %v1510_v45 = vunpack.c.l.bf16 %v3710_v25 }
 0x38d   : > { %4302 = vtanh.f32 %v1449_v30  ;;  %v1470_v49 = vadd.f32 1.0, %v4291_v63 }
 0x38e   : > { %4304 = vrcp.f32 %v1472_v46 }
 0x38f   : > { %4306 = vrcp.f32 %v1470_v49  ;;  %v3709_v49 = vld [vmem:[%s4991_s20 + $0x68] sm:$0xff] }
 0x395   : > { %v4293_v4 = vpop.eup %4292 }
 0x396   : > { %v4295_v48 = vpop.eup %4294 }
 0x397   : > { %v4297_v10 = vpop.eup %4296  ;;  %v1490_v29 = vmul.f32 %v4295_v48, %v4293_v4  ;;  %v1511_v48 = vunpack.c.h.bf16 %v3710_v25 }
 0x398   : > { %v4299_v50 = vpop.eup %4298  ;;  %v1488_v51 = vmul.f32 %v4297_v10, %v5202_v28 }
 0x399   : > { %v4301_v31 = vpop.eup %4300  ;;  %v1473_v39 = vadd.f32 1.0, %v4299_v50 }
 0x39a   : > { %v4303_v32 = vpop.eup %4302  ;;  %v5272_v36 = vadd.f32 %v1490_v29, %v1488_v51 }
 0x39b   : > { %v4305_v37 = vpop.eup %4304  ;;  %v1491_v52 = vmul.f32 %v4303_v32, %v4301_v31 }
 0x39c   : > { %4308 = vtanh.f32 %v5272_v36  ;;  %v1489_v34 = vmul.f32 %v4305_v37, %v5206_v47  ;;  %v4307_v28 = vpop.eup %4306  ;;  %v5283_v47 = vld [vmem:[#allocation10 + $0xe4] ss:$16 sps:$4 sm:$0xff]  }
 0x39d   : > { %4310 = vrcp.f32 %v1473_v39  ;;  %2058 = vmatprep.subr.bf16.mxu0 %v5283_v47  ;;  %v1508_v39 = vunpack.c.l.bf16 %v3709_v49 }
 0x39e   : > { %v5276_v53 = vadd.f32 %v1491_v52, %v1489_v34  ;;  %v3711_v52 = vld [vmem:[%s4991_s20 + $0x78] sm:$0xff] }
 0x39f   : > { %v1513_v25 = vunpack.c.h.bf16 %v3711_v52 }
 0x3a0   : > { %4312 = vtanh.f32 %v5276_v53 }
 0x3a9   : > { %v4309_v54 = vpop.eup %4308 }
 0x3aa   : > { %v1496_v55 = vmul.f32 %v4309_v54, %v4307_v28  ;;  %v4311_v56 = vpop.eup %4310 }
 0x3ac   : > { %3706 = vst [vmem:[%s5010_s0 + $0x20] sm:$0xff] %v1496_v55 }
 0x3ad   : > { %v4313_v57 = vpop.eup %4312 }
 0x3ae   : > { %v1497_v58 = vmul.f32 %v4313_v57, %v4311_v56  ;;  %v1509_v57 = vunpack.c.h.bf16 %v3709_v49 }
 0x3b0   : > { %3707 = vst [vmem:[%s5010_s0 + $0x28] sm:$0xff] %v1497_v58  ;;  %v1514_v59 = vpack.c.bf16 %v1497_v58, %v1496_v55  ;;  %v1512_v55 = vunpack.c.l.bf16 %v3711_v52 }
 0x3b2   : > { %1740 = vmatmul.mubr.bf16.vlgmr.msra.gmra.mxu0 %v1514_v59  ;;  %1783 = vmatmul.mubr.bf16.vlgmr.msra.gmra.mxu1 %v1514_v59 }
 0x3b3   : > { %2090 = vmatprep.mubr.bf16.mxu0 %v4725_v6  ;;  %2133 = vmatprep.mubr.bf16.mxu1 %v4725_v6 }
 0x3b4   : > { %2059 = vmatpush1.bf16.msra.mxu0 %v5287_v61  ;;  %2102 = vmatpush1.bf16.msra.mxu1 %v5289_v62 }
 0x3b5   : > { %2060 = vmatprep.subr.bf16.mxu0 %v5295_v0  ;;  %2103 = vmatprep.subr.bf16.mxu1 %v5297_v1 }
 0x3b8   : > { %2061 = vmatpush1.bf16.msra.mxu0 %v5299_v2  ;;  %2104 = vmatpush1.bf16.msra.mxu1 %v5301_v3 }
 0x3b9   : > { %2062 = vmatprep.subr.bf16.mxu0 %v5231_v5  ;;  %2105 = vmatprep.subr.bf16.mxu1 %v5308_v35 }
 0x3bc   : > { %2063 = vmatpush1.bf16.msra.mxu0 %v5233_v7  ;;  %2106 = vmatpush1.bf16.msra.mxu1 %v5310_v38 }
 0x3bd   : > { %2064 = vmatprep.subr.bf16.mxu0 %v5237_v8  ;;  %2107 = vmatprep.subr.bf16.mxu1 %v5316_v40 }
 0x3c0   : > { %2065 = vmatpush1.bf16.msra.mxu0 %v5239_v11  ;;  %2108 = vmatpush1.bf16.msra.mxu1 %v5318_v41 }
 0x3c1   : > { %2066 = vmatprep.subr.bf16.mxu0 %v5241_v14  ;;  %2109 = vmatprep.subr.bf16.mxu1 %v5320_v42 }
 0x3c4   : > { %2067 = vmatpush1.bf16.msra.mxu0 %v5245_v15  ;;  %2110 = vmatpush1.bf16.msra.mxu1 %v5325_v43 }
 0x3c5   : > { %2068 = vmatprep.subr.bf16.mxu0 %v5248_v18  ;;  %2111 = vmatprep.subr.bf16.mxu1 %v5329_v44 }
 0x3c8   : > { %2069 = vmatpush1.bf16.msra.mxu0 %v5251_v19  ;;  %2112 = vmatpush1.bf16.msra.mxu1 %v5333_v9 }
 0x3c9   : > { %2070 = vmatprep.subr.bf16.mxu0 %v5254_v20  ;;  %2113 = vmatprep.subr.bf16.mxu1 %v5337_v12 }
 0x3cc   : > { %2071 = vmatpush1.bf16.msra.mxu0 %v5257_v23  ;;  %2114 = vmatpush1.bf16.msra.mxu1 %v5341_v13 }
 0x3cd   : > { %2072 = vmatprep.subr.bf16.mxu0 %v5260_v24  ;;  %2115 = vmatprep.subr.bf16.mxu1 %v5345_v16 }
 0x3d0   : > { %2073 = vmatpush1.bf16.msra.mxu0 %v5263_v27  ;;  %2116 = vmatpush1.bf16.msra.mxu1 %v5349_v17 }
 0x3d1   : > { %2409 = vmatprep.subr.bf16.mxu0 %v5283_v47  ;;  %2452 = vmatprep.subr.bf16.mxu1 %v5285_v60 }
 0x472   : > { %v1741_v30 = vpop.f32.mrf.mxu0  ;;  %v1784_v50 = vpop.f32.mrf.mxu1 }
 0x473   : > { %v1793_v33 = vadd.f32 %v1741_v30, %v1506_v22  ;;  %v1795_v54 = vadd.f32 %v1784_v50, %v1508_v39 }
 0x474   : > { %v1743_v46 = vpop.f32.mrf.mxu0  ;;  %v1786_v34 = vpop.f32.mrf.mxu1 }
 0x475   : > { %v3744_v63 = vmul.f32 -1.442695, %v1793_v33  ;;  %v1794_v4 = vadd.f32 %v1743_v46, %v1507_v26  ;;  %v3746_v58 = vmul.f32 -1.442695, %v1795_v54  ;;  %v1796_v22 = vadd.f32 %v1786_v34, %v1509_v57 }
 0x476   : > { %v1745_v10 = vpop.f32.mrf.mxu0  ;;  %v1788_v56 = vpop.f32.mrf.mxu1 }
 0x477   : > { %4314 = vpow2.f32 %v3744_v63  ;;  %v3745_v51 = vmul.f32 -1.442695, %v1794_v4  ;;  %v1797_v29 = vadd.f32 %v1745_v10, %v1510_v45  ;;  %v1799_v59 = vadd.f32 %v1788_v56, %v1512_v55 }
 0x478   : > { %v1747_v31 = vpop.f32.mrf.mxu0  ;;  %v1790_v30 = vpop.f32.mrf.mxu1 }
 0x479   : > { %4316 = vpow2.f32 %v3745_v51  ;;  %v3747_v32 = vmul.f32 -1.442695, %v1797_v29  ;;  %v1798_v37 = vadd.f32 %v1747_v31, %v1511_v48  ;;  %v3749_v45 = vmul.f32 -1.442695, %v1799_v59 }
 0x47a   : > { %v1800_v4 = vadd.f32 %v1790_v30, %v1513_v25 }
 0x47b   : > { %4318 = vpow2.f32 %v3747_v32  ;;  %v3748_v28 = vmul.f32 -1.442695, %v1798_v37 }
 0x47d   : > { %4320 = vpow2.f32 %v3748_v28 }
 0x47e   : > { %4322 = vpow2.f32 %v3746_v58 }
 0x484   : > { %v4315_v21 = vpop.eup %4314 }
 0x485   : > { %v1819_v26 = vadd.f32 1.0, %v4315_v21 }
 0x486   : > { %v4317_v33 = vpop.eup %4316 }
 0x487   : > { %4324 = vrcp.f32 %v1819_v26  ;;  %v1820_v46 = vadd.f32 1.0, %v4317_v33 }
 0x488   : > { %v4319_v63 = vpop.eup %4318  ;;  %4326 = vtanh.f32 %v1796_v22 }
 0x489   : > { %4328 = vrcp.f32 %v1820_v46  ;;  %v1822_v48 = vadd.f32 1.0, %v4319_v63  ;;  %v3754_v46 = vld [vmem:[%s4991_s20 + $0x90] sm:$0xff] }
 0x48a   : > { %v4321_v10 = vpop.eup %4320  ;;  %4330 = vpow2.f32 %v3749_v45 }
 0x48b   : > { %4332 = vrcp.f32 %v1822_v48  ;;  %v1823_v49 = vadd.f32 1.0, %v4321_v10  ;;  %v4323_v50 = vpop.eup %4322  ;;  %v1861_v10 = vunpack.c.l.bf16 %v3754_v46 }
 0x48c   : > { %4334 = vtanh.f32 %v1800_v4  ;;  %v1821_v32 = vadd.f32 1.0, %v4323_v50 }
 0x48d   : > { %4336 = vrcp.f32 %v1823_v49 }
 0x48e   : > { %4338 = vrcp.f32 %v1821_v32  ;;  %v3753_v32 = vld [vmem:[%s4991_s20 + $0x88] sm:$0xff] }
 0x494   : > { %v4325_v51 = vpop.eup %4324 }
 0x495   : > { %v4327_v29 = vpop.eup %4326 }
 0x496   : > { %v4329_v31 = vpop.eup %4328  ;;  %v1841_v34 = vmul.f32 %v4327_v29, %v4325_v51  ;;  %v1862_v29 = vunpack.c.h.bf16 %v3754_v46 }
 0x497   : > { %v4331_v37 = vpop.eup %4330  ;;  %v1839_v39 = vmul.f32 %v4329_v31, %v5272_v36 }
 0x498   : > { %v4333_v52 = vpop.eup %4332  ;;  %v1824_v56 = vadd.f32 1.0, %v4331_v37 }
 0x499   : > { %v4335_v28 = vpop.eup %4334  ;;  %v5362_v54 = vadd.f32 %v1841_v34, %v1839_v39 }
 0x49a   : > { %v4337_v55 = vpop.eup %4336  ;;  %v1842_v58 = vmul.f32 %v4335_v28, %v4333_v52 }
 0x49b   : > { %4340 = vtanh.f32 %v5362_v54  ;;  %v1840_v57 = vmul.f32 %v4337_v55, %v5276_v53  ;;  %v4339_v36 = vpop.eup %4338  ;;  %v3752_v53 = vld [vmem:[%s4991_s20 + $0x80] sm:$0xff] }
 0x49c   : > { %4342 = vrcp.f32 %v1824_v56  ;;  %v1857_v45 = vunpack.c.l.bf16 %v3752_v53  ;;  %v1858_v63 = vunpack.c.h.bf16 %v3752_v53  ;;  %v1859_v56 = vunpack.c.l.bf16 %v3753_v32 }
 0x49d   : > { %v5366_v59 = vadd.f32 %v1842_v58, %v1840_v57  ;;  %v3755_v58 = vld [vmem:[%s4991_s20 + $0x98] sm:$0xff] }
 0x49e   : > { %v1864_v46 = vunpack.c.h.bf16 %v3755_v58 }
 0x49f   : > { %4344 = vtanh.f32 %v5366_v59 }
 0x4a8   : > { %v4341_v21 = vpop.eup %4340 }
 0x4a9   : > { %v1847_v22 = vmul.f32 %v4341_v21, %v4339_v36  ;;  %v4343_v25 = vpop.eup %4342 }
 0x4ab   : > { %3750 = vst [vmem:[%s5010_s0 + $0x30] sm:$0xff] %v1847_v22 }
 0x4ac   : > { %v4345_v26 = vpop.eup %4344 }
 0x4ad   : > { %v1848_v30 = vmul.f32 %v4345_v26, %v4343_v25  ;;  %v1860_v26 = vunpack.c.h.bf16 %v3753_v32 }
 0x4af   : > { %3751 = vst [vmem:[%s5010_s0 + $0x38] sm:$0xff] %v1848_v30  ;;  %v1865_v33 = vpack.c.bf16 %v1848_v30, %v1847_v22  ;;  %v1863_v22 = vunpack.c.l.bf16 %v3755_v58 }
 0x4b1   : > { %2091 = vmatmul.mubr.bf16.vlgmr.msra.gmra.mxu0 %v1865_v33  ;;  %2134 = vmatmul.mubr.bf16.vlgmr.msra.gmra.mxu1 %v1865_v33 }
 0x4b2   : > { %2410 = vmatpush1.bf16.msra.mxu0 %v5287_v61  ;;  %2453 = vmatpush1.bf16.msra.mxu1 %v5289_v62 }
 0x4b3   : > { %2411 = vmatprep.subr.bf16.mxu0 %v5295_v0  ;;  %2454 = vmatprep.subr.bf16.mxu1 %v5297_v1 }
 0x4b4   : > { %2441 = vmatprep.mubr.bf16.mxu0 %v4725_v6  ;;  %2484 = vmatprep.mubr.bf16.mxu1 %v4725_v6 }
 0x4b6   : > { %2412 = vmatpush1.bf16.msra.mxu0 %v5299_v2  ;;  %2455 = vmatpush1.bf16.msra.mxu1 %v5301_v3 }
 0x4b7   : > { %2413 = vmatprep.subr.bf16.mxu0 %v5231_v5  ;;  %2456 = vmatprep.subr.bf16.mxu1 %v5308_v35 }
 0x4ba   : > { %2414 = vmatpush1.bf16.msra.mxu0 %v5233_v7  ;;  %2457 = vmatpush1.bf16.msra.mxu1 %v5310_v38 }
 0x4bb   : > { %2415 = vmatprep.subr.bf16.mxu0 %v5237_v8  ;;  %2458 = vmatprep.subr.bf16.mxu1 %v5316_v40 }
 0x4be   : > { %2416 = vmatpush1.bf16.msra.mxu0 %v5239_v11  ;;  %2459 = vmatpush1.bf16.msra.mxu1 %v5318_v41 }
 0x4bf   : > { %2417 = vmatprep.subr.bf16.mxu0 %v5241_v14  ;;  %2460 = vmatprep.subr.bf16.mxu1 %v5320_v42 }
 0x4c2   : > { %2418 = vmatpush1.bf16.msra.mxu0 %v5245_v15  ;;  %2461 = vmatpush1.bf16.msra.mxu1 %v5325_v43 }
 0x4c3   : > { %2419 = vmatprep.subr.bf16.mxu0 %v5248_v18  ;;  %2462 = vmatprep.subr.bf16.mxu1 %v5329_v44 }
 0x4c6   : > { %2420 = vmatpush1.bf16.msra.mxu0 %v5251_v19  ;;  %2463 = vmatpush1.bf16.msra.mxu1 %v5333_v9 }
 0x4c7   : > { %2421 = vmatprep.subr.bf16.mxu0 %v5254_v20  ;;  %2464 = vmatprep.subr.bf16.mxu1 %v5337_v12 }
 0x4ca   : > { %2422 = vmatpush1.bf16.msra.mxu0 %v5257_v23  ;;  %2465 = vmatpush1.bf16.msra.mxu1 %v5341_v13 }
 0x4cb   : > { %2423 = vmatprep.subr.bf16.mxu0 %v5260_v24  ;;  %2466 = vmatprep.subr.bf16.mxu1 %v5345_v16 }
 0x4ce   : > { %2424 = vmatpush1.bf16.msra.mxu0 %v5263_v27  ;;  %2467 = vmatpush1.bf16.msra.mxu1 %v5349_v17 }
 0x4cf   : > { %2760 = vmatprep.subr.bf16.mxu0 %v5283_v47  ;;  %2803 = vmatprep.subr.bf16.mxu1 %v5285_v60 }
 0x571   : > { %v2092_v4 = vpop.f32.mrf.mxu0  ;;  %v2135_v37 = vpop.f32.mrf.mxu1 }
 0x572   : > { %v2144_v48 = vadd.f32 %v2092_v4, %v1857_v45  ;;  %v2146_v21 = vadd.f32 %v2135_v37, %v1859_v56 }
 0x573   : > { %v2094_v49 = vpop.f32.mrf.mxu0  ;;  %v2137_v57 = vpop.f32.mrf.mxu1 }
 0x574   : > { %v3788_v50 = vmul.f32 -1.442695, %v2144_v48  ;;  %v2145_v51 = vadd.f32 %v2094_v49, %v1858_v63  ;;  %v3790_v30 = vmul.f32 -1.442695, %v2146_v21  ;;  %v2147_v45 = vadd.f32 %v2137_v57, %v1860_v26 }
 0x575   : > { %v2096_v31 = vpop.f32.mrf.mxu0  ;;  %v2139_v25 = vpop.f32.mrf.mxu1 }
 0x576   : > { %4346 = vpow2.f32 %v3788_v50  ;;  %v3789_v39 = vmul.f32 -1.442695, %v2145_v51  ;;  %v2148_v34 = vadd.f32 %v2096_v31, %v1861_v10  ;;  %v2150_v33 = vadd.f32 %v2139_v25, %v1863_v22 }
 0x577   : > { %v2098_v52 = vpop.f32.mrf.mxu0  ;;  %v2141_v4 = vpop.f32.mrf.mxu1 }
 0x578   : > { %4348 = vpow2.f32 %v3789_v39  ;;  %v3791_v28 = vmul.f32 -1.442695, %v2148_v34  ;;  %v2149_v55 = vadd.f32 %v2098_v52, %v1862_v29  ;;  %v3793_v10 = vmul.f32 -1.442695, %v2150_v33 }
 0x579   : > { %v2151_v51 = vadd.f32 %v2141_v4, %v1864_v46 }
 0x57a   : > { %4350 = vpow2.f32 %v3791_v28  ;;  %v3792_v36 = vmul.f32 -1.442695, %v2149_v55 }
 0x57c   : > { %4352 = vpow2.f32 %v3792_v36 }
 0x57d   : > { %4354 = vpow2.f32 %v3790_v30 }
 0x583   : > { %v4347_v53 = vpop.eup %4346 }
 0x584   : > { %v2170_v63 = vadd.f32 1.0, %v4347_v53 }
 0x585   : > { %v4349_v48 = vpop.eup %4348 }
 0x586   : > { %4356 = vrcp.f32 %v2170_v63  ;;  %v2171_v49 = vadd.f32 1.0, %v4349_v48 }
 0x587   : > { %v4351_v50 = vpop.eup %4350  ;;  %4358 = vtanh.f32 %v2147_v45 }
 0x588   : > { %4360 = vrcp.f32 %v2171_v49  ;;  %v2173_v29 = vadd.f32 1.0, %v4351_v50 }
 0x589   : > { %v4353_v31 = vpop.eup %4352  ;;  %4362 = vpow2.f32 %v3793_v10 }
 0x58a   : > { %4364 = vrcp.f32 %v2173_v29  ;;  %v2174_v32 = vadd.f32 1.0, %v4353_v31  ;;  %v4355_v37 = vpop.eup %4354 }
 0x58b   : > { %4366 = vtanh.f32 %v2151_v51  ;;  %v2172_v28 = vadd.f32 1.0, %v4355_v37 }
 0x58c   : > { %4368 = vrcp.f32 %v2174_v32  ;;  %v3799_v32 = vld [vmem:[%s4991_s20 + $0xb8] sm:$0xff] }
 0x58d   : > { %4370 = vrcp.f32 %v2172_v28 }
 0x593   : > { %v4357_v39 = vpop.eup %4356 }
 0x594   : > { %v4359_v34 = vpop.eup %4358 }
 0x595   : > { %v4361_v52 = vpop.eup %4360  ;;  %v2192_v57 = vmul.f32 %v4359_v34, %v4357_v39  ;;  %v2214_v34 = vunpack.c.l.bf16 %v3799_v32 }
 0x596   : > { %v4363_v55 = vpop.eup %4362  ;;  %v2190_v56 = vmul.f32 %v4361_v52, %v5362_v54 }
 0x597   : > { %v4365_v58 = vpop.eup %4364  ;;  %v2175_v25 = vadd.f32 1.0, %v4363_v55 }
 0x598   : > { %v4367_v36 = vpop.eup %4366  ;;  %v5410_v21 = vadd.f32 %v2192_v57, %v2190_v56 }
 0x599   : > { %v4369_v22 = vpop.eup %4368  ;;  %v2193_v30 = vmul.f32 %v4367_v36, %v4365_v58  ;;  %v2215_v36 = vunpack.c.h.bf16 %v3799_v32 }
 0x59a   : > { %4372 = vtanh.f32 %v5410_v21  ;;  %v2191_v26 = vmul.f32 %v4369_v22, %v5366_v59  ;;  %v4371_v54 = vpop.eup %4370  ;;  %v3797_v59 = vld [vmem:[%s4991_s20 + $0xa8] sm:$0xff] }
 0x59b   : > { %4374 = vrcp.f32 %v2175_v25  ;;  %v2210_v29 = vunpack.c.l.bf16 %v3797_v59  ;;  %v2211_v28 = vunpack.c.h.bf16 %v3797_v59 }
 0x59c   : > { %v5414_v33 = vadd.f32 %v2193_v30, %v2191_v26 }
 0x59e   : > { %4376 = vtanh.f32 %v5414_v33 }
 0x5a7   : > { %v4373_v53 = vpop.eup %4372 }
 0x5a8   : > { %v2198_v45 = vmul.f32 %v4373_v53, %v4371_v54  ;;  %v4375_v46 = vpop.eup %4374 }
 0x5aa   : > { %3794 = vst [vmem:[%s5010_s0 + $0x40] sm:$0xff] %v2198_v45 }
 0x5ab   : > { %v4377_v63 = vpop.eup %4376 }
 0x5ac   : > { %v2199_v4 = vmul.f32 %v4377_v63, %v4375_v46 }
 0x5ae   : > { %3795 = vst [vmem:[%s5010_s0 + $0x48] sm:$0xff] %v2199_v4  ;;  %v2216_v48 = vpack.c.bf16 %v2199_v4, %v2198_v45 }
 0x5b0   : > { %2442 = vmatmul.mubr.bf16.vlgmr.msra.gmra.mxu0 %v2216_v48  ;;  %2485 = vmatmul.mubr.bf16.vlgmr.msra.gmra.mxu1 %v2216_v48 }
 0x5b1   : > { %2761 = vmatpush1.bf16.msra.mxu0 %v5287_v61  ;;  %2804 = vmatpush1.bf16.msra.mxu1 %v5289_v62 }
 0x5b2   : > { %2762 = vmatprep.subr.bf16.mxu0 %v5295_v0  ;;  %2805 = vmatprep.subr.bf16.mxu1 %v5297_v1 }
 0x5b3   : > { %2792 = vmatprep.mubr.bf16.mxu0 %v4725_v6  ;;  %2835 = vmatprep.mubr.bf16.mxu1 %v4725_v6 }
 0x5b5   : > { %2763 = vmatpush1.bf16.msra.mxu0 %v5299_v2  ;;  %2806 = vmatpush1.bf16.msra.mxu1 %v5301_v3 }
 0x5b6   : > { %2764 = vmatprep.subr.bf16.mxu0 %v5231_v5  ;;  %2807 = vmatprep.subr.bf16.mxu1 %v5308_v35  ;;  %v3796_v5 = vld [vmem:[%s4991_s20 + $0xa0] sm:$0xff] }
 0x5b9   : > { %2765 = vmatpush1.bf16.msra.mxu0 %v5233_v7  ;;  %2808 = vmatpush1.bf16.msra.mxu1 %v5310_v38  ;;  %v2208_v7 = vunpack.c.l.bf16 %v3796_v5 }
 0x5ba   : > { %2766 = vmatprep.subr.bf16.mxu0 %v5237_v8  ;;  %2809 = vmatprep.subr.bf16.mxu1 %v5316_v40  ;;  %v3798_v8 = vld [vmem:[%s4991_s20 + $0xb0] sm:$0xff] }
 0x5bd   : > { %2767 = vmatpush1.bf16.msra.mxu0 %v5239_v11  ;;  %2810 = vmatpush1.bf16.msra.mxu1 %v5318_v41  ;;  %v2209_v11 = vunpack.c.h.bf16 %v3796_v5 }
 0x5be   : > { %2768 = vmatprep.subr.bf16.mxu0 %v5241_v14  ;;  %2811 = vmatprep.subr.bf16.mxu1 %v5320_v42 }
 0x5c1   : > { %2769 = vmatpush1.bf16.msra.mxu0 %v5245_v15  ;;  %2812 = vmatpush1.bf16.msra.mxu1 %v5325_v43 }
 0x5c2   : > { %2770 = vmatprep.subr.bf16.mxu0 %v5248_v18  ;;  %2813 = vmatprep.subr.bf16.mxu1 %v5329_v44  ;;  %v2212_v18 = vunpack.c.l.bf16 %v3798_v8 }
 0x5c5   : > { %2771 = vmatpush1.bf16.msra.mxu0 %v5251_v19  ;;  %2814 = vmatpush1.bf16.msra.mxu1 %v5333_v9 }
 0x5c6   : > { %2772 = vmatprep.subr.bf16.mxu0 %v5254_v20  ;;  %2815 = vmatprep.subr.bf16.mxu1 %v5337_v12 }
 0x5c9   : > { %2773 = vmatpush1.bf16.msra.mxu0 %v5257_v23  ;;  %2816 = vmatpush1.bf16.msra.mxu1 %v5341_v13 }
 0x5ca   : > { %2774 = vmatprep.subr.bf16.mxu0 %v5260_v24  ;;  %2817 = vmatprep.subr.bf16.mxu1 %v5345_v16  ;;  %v2213_v24 = vunpack.c.h.bf16 %v3798_v8 }
 0x5cd   : > { %2775 = vmatpush1.bf16.msra.mxu0 %v5263_v27  ;;  %2818 = vmatpush1.bf16.msra.mxu1 %v5349_v17 }
 0x5ce   : > { %3111 = vmatprep.subr.bf16.mxu0 %v5283_v47  ;;  %3154 = vmatprep.subr.bf16.mxu1 %v5285_v60 }
 0x670   : > { %v2443_v14 = vpop.f32.mrf.mxu0  ;;  %v2486_v10 = vpop.f32.mrf.mxu1 }
 0x671   : > { %v2495_v15 = vadd.f32 %v2443_v14, %v2208_v7  ;;  %v2497_v39 = vadd.f32 %v2486_v10, %v2210_v29 }
 0x672   : > { %v2445_v19 = vpop.f32.mrf.mxu0  ;;  %v2488_v31 = vpop.f32.mrf.mxu1 }
 0x673   : > { %v3832_v20 = vmul.f32 -1.442695, %v2495_v15  ;;  %v2496_v23 = vadd.f32 %v2445_v19, %v2209_v11  ;;  %v3834_v55 = vmul.f32 -1.442695, %v2497_v39  ;;  %v2498_v58 = vadd.f32 %v2488_v31, %v2211_v28 }
 0x674   : > { %v2447_v27 = vpop.f32.mrf.mxu0  ;;  %v2490_v52 = vpop.f32.mrf.mxu1 }
 0x675   : > { %4378 = vpow2.f32 %v3832_v20  ;;  %v3833_v49 = vmul.f32 -1.442695, %v2496_v23  ;;  %v2499_v47 = vadd.f32 %v2447_v27, %v2212_v18  ;;  %v2501_v56 = vadd.f32 %v2490_v52, %v2214_v34  ;;  %v3841_v52 = vld [vmem:[%s4991_s20 + $0xc8] sm:$0xff] }
 0x676   : > { %v2449_v50 = vpop.f32.mrf.mxu0  ;;  %v2492_v25 = vpop.f32.mrf.mxu1 }
 0x677   : > { %4380 = vpow2.f32 %v3833_v49  ;;  %v3835_v60 = vmul.f32 -1.442695, %v2499_v47  ;;  %v2500_v51 = vadd.f32 %v2449_v50, %v2213_v24  ;;  %v3837_v30 = vmul.f32 -1.442695, %v2501_v56 }
 0x678   : > { %v2502_v45 = vadd.f32 %v2492_v25, %v2215_v36 }
 0x679   : > { %4382 = vpow2.f32 %v3835_v60  ;;  %v3836_v37 = vmul.f32 -1.442695, %v2500_v51 }
 0x67b   : > { %4384 = vpow2.f32 %v3836_v37 }
 0x67c   : > { %4386 = vpow2.f32 %v3834_v55 }
 0x682   : > { %v4379_v57 = vpop.eup %4378 }
 0x683   : > { %v2521_v22 = vadd.f32 1.0, %v4379_v57 }
 0x684   : > { %v4381_v26 = vpop.eup %4380 }
 0x685   : > { %4388 = vrcp.f32 %v2521_v22  ;;  %v2522_v54 = vadd.f32 1.0, %v4381_v26  ;;  %v2561_v22 = vunpack.c.l.bf16 %v3841_v52  ;;  %v3843_v26 = vld [vmem:[%s4991_s20 + $0xd8] sm:$0xff] }
 0x686   : > { %v4383_v53 = vpop.eup %4382  ;;  %4390 = vtanh.f32 %v2498_v58 }
 0x687   : > { %4392 = vrcp.f32 %v2522_v54  ;;  %v2524_v46 = vadd.f32 1.0, %v4383_v53  ;;  %v2565_v53 = vunpack.c.l.bf16 %v3843_v26 }
 0x688   : > { %v4385_v63 = vpop.eup %4384  ;;  %4394 = vpow2.f32 %v3837_v30 }
 0x689   : > { %4396 = vrcp.f32 %v2524_v46  ;;  %v2525_v4 = vadd.f32 1.0, %v4385_v63  ;;  %v4387_v48 = vpop.eup %4386  ;;  %v2562_v46 = vunpack.c.h.bf16 %v3841_v52 }
 0x68a   : > { %4398 = vtanh.f32 %v2502_v45  ;;  %v2523_v11 = vadd.f32 1.0, %v4387_v48 }
 0x68b   : > { %4400 = vrcp.f32 %v2525_v4 }
 0x68c   : > { %4402 = vrcp.f32 %v2523_v11 }
 0x692   : > { %v4389_v5 = vpop.eup %4388 }
 0x693   : > { %v4391_v7 = vpop.eup %4390 }
 0x694   : > { %v4393_v8 = vpop.eup %4392  ;;  %v2543_v18 = vmul.f32 %v4391_v7, %v4389_v5  ;;  %v2566_v7 = vunpack.c.h.bf16 %v3843_v26 }
 0x695   : > { %v4395_v14 = vpop.eup %4394  ;;  %v2541_v15 = vmul.f32 %v4393_v8, %v5410_v21 }
 0x696   : > { %v4397_v19 = vpop.eup %4396  ;;  %v2526_v27 = vadd.f32 1.0, %v4395_v14 }
 0x697   : > { %v4399_v20 = vpop.eup %4398  ;;  %v5458_v23 = vadd.f32 %v2543_v18, %v2541_v15 }
 0x698   : > { %v4401_v24 = vpop.eup %4400  ;;  %v2544_v10 = vmul.f32 %v4399_v20, %v4397_v19 }
 0x699   : > { %4404 = vtanh.f32 %v5458_v23  ;;  %v2542_v59 = vmul.f32 %v4401_v24, %v5414_v33  ;;  %v4403_v21 = vpop.eup %4402 }
 0x69a   : > { %4406 = vrcp.f32 %v2526_v27 }
 0x69b   : > { %v5462_v49 = vadd.f32 %v2544_v10, %v2542_v59 }
 0x69d   : > { %4408 = vtanh.f32 %v5462_v49 }
 0x6a6   : > { %v4405_v47 = vpop.eup %4404 }
 0x6a7   : > { %v2549_v50 = vmul.f32 %v4405_v47, %v4403_v21  ;;  %v4407_v60 = vpop.eup %4406 }
 0x6a9   : > { %3838 = vst [vmem:[%s5010_s0 + $0x50] sm:$0xff] %v2549_v50 }
 0x6aa   : > { %v4409_v51 = vpop.eup %4408 }
 0x6ab   : > { %v2550_v29 = vmul.f32 %v4409_v51, %v4407_v60 }
 0x6ad   : > { %3839 = vst [vmem:[%s5010_s0 + $0x58] sm:$0xff] %v2550_v29  ;;  %v2567_v31 = vpack.c.bf16 %v2550_v29, %v2549_v50 }
 0x6af   : > { %2793 = vmatmul.mubr.bf16.vlgmr.msra.gmra.mxu0 %v2567_v31  ;;  %2836 = vmatmul.mubr.bf16.vlgmr.msra.gmra.mxu1 %v2567_v31 }
 0x6b0   : > { %3112 = vmatpush1.bf16.msra.mxu0 %v5287_v61  ;;  %3155 = vmatpush1.bf16.msra.mxu1 %v5289_v62  ;;  %v4200_v61 = vld [vmem:[#allocation10 + $0xa0] ss:$16 sps:$4 sm:$0xff]   ;;  %v4205_v62 = vld [vmem:[#allocation10 + $0x84] ss:$16 sps:$4 sm:$0xff]  }
 0x6b1   : > { %3113 = vmatprep.subr.bf16.mxu0 %v5295_v0  ;;  %3156 = vmatprep.subr.bf16.mxu1 %v5297_v1  ;;  %v4203_v0 = vld [vmem:[#allocation10 + $0x80] ss:$16 sps:$4 sm:$0xff]   ;;  %v4208_v1 = vld [vmem:[#allocation10 + $0x64] ss:$16 sps:$4 sm:$0xff]  }
 0x6b2   : > { %3143 = vmatprep.mubr.bf16.mxu0 %v4725_v6  ;;  %3186 = vmatprep.mubr.bf16.mxu1 %v4725_v6  ;;  %v4202_v6 = vld [vmem:[#allocation10 + $0xa4] ss:$16 sps:$4 sm:$0xff]  }
 0x6b4   : > { %3114 = vmatpush1.bf16.msra.mxu0 %v5299_v2  ;;  %3157 = vmatpush1.bf16.msra.mxu1 %v5301_v3  ;;  %v4206_v2 = vld [vmem:[#allocation10 + $0x60] ss:$16 sps:$4 sm:$0xff]   ;;  %v4211_v3 = vld [vmem:[#allocation10 + $0x44] ss:$16 sps:$4 sm:$0xff]  }
 0x6b5   : > { %3158 = vmatprep.subr.bf16.mxu1 %v5308_v35  ;;  %3115 = vmatprep.subr.bf16.mxu0 %v4202_v6  ;;  %v4209_v35 = vld [vmem:[#allocation10 + $0x40] ss:$16 sps:$4 sm:$0xff]  }
 0x6b8   : > { %3159 = vmatpush1.bf16.msra.mxu1 %v5310_v38  ;;  %3116 = vmatpush1.bf16.msra.mxu0 %v4200_v61  ;;  %v4214_v38 = vld [vmem:[#allocation10 + $0x24] ss:$16 sps:$4 sm:$0xff]  }
 0x6b9   : > { %3160 = vmatprep.subr.bf16.mxu1 %v5316_v40  ;;  %3117 = vmatprep.subr.bf16.mxu0 %v4205_v62  ;;  %v4212_v40 = vld [vmem:[#allocation10 + $0x20] ss:$16 sps:$4 sm:$0xff]  }
 0x6bc   : > { %3161 = vmatpush1.bf16.msra.mxu1 %v5318_v41  ;;  %3118 = vmatpush1.bf16.msra.mxu0 %v4203_v0  ;;  %v4217_v41 = vld [vmem:[#allocation10 + $0x4] ss:$16 sps:$4 sm:$0xff]  }
 0x6bd   : > { %3162 = vmatprep.subr.bf16.mxu1 %v5320_v42  ;;  %3119 = vmatprep.subr.bf16.mxu0 %v4208_v1  ;;  %v4215_v42 = vld [vmem:[#allocation10] ss:$16 sps:$4 sm:$0xff]  }
 0x6c0   : > { %3163 = vmatpush1.bf16.msra.mxu1 %v5325_v43  ;;  %3120 = vmatpush1.bf16.msra.mxu0 %v4206_v2  ;;  %v3840_v43 = vld [vmem:[%s4991_s20 + $0xc0] sm:$0xff] }
 0x6c1   : > { %3164 = vmatprep.subr.bf16.mxu1 %v5329_v44  ;;  %3121 = vmatprep.subr.bf16.mxu0 %v4211_v3  ;;  %v2559_v44 = vunpack.c.l.bf16 %v3840_v43 }
 0x6c4   : > { %3165 = vmatpush1.bf16.msra.mxu1 %v5333_v9  ;;  %3122 = vmatpush1.bf16.msra.mxu0 %v4209_v35  ;;  %v3842_v9 = vld [vmem:[%s4991_s20 + $0xd0] sm:$0xff] }
 0x6c5   : > { %3166 = vmatprep.subr.bf16.mxu1 %v5337_v12  ;;  %3123 = vmatprep.subr.bf16.mxu0 %v4214_v38  ;;  %v2560_v12 = vunpack.c.h.bf16 %v3840_v43  ;;  %v2564_v39 = vunpack.c.h.bf16 %v3842_v9 }
 0x6c8   : > { %3167 = vmatpush1.bf16.msra.mxu1 %v5341_v13  ;;  %3124 = vmatpush1.bf16.msra.mxu0 %v4212_v40 }
 0x6c9   : > { %3168 = vmatprep.subr.bf16.mxu1 %v5345_v16  ;;  %3125 = vmatprep.subr.bf16.mxu0 %v4217_v41 }
 0x6cc   : > { %3169 = vmatpush1.bf16.msra.mxu1 %v5349_v17  ;;  %3126 = vmatpush1.bf16.msra.mxu0 %v4215_v42  ;;  %v2563_v17 = vunpack.c.l.bf16 %v3842_v9 }
 0x76f   : > { %v2794_v13 = vpop.f32.mrf.mxu0  ;;  %v2837_v28 = vpop.f32.mrf.mxu1 }
 0x770   : > { %v2846_v16 = vadd.f32 %v2794_v13, %v2559_v44  ;;  %v2848_v54 = vadd.f32 %v2837_v28, %v2561_v22  ;;  %v3885_v28 = vld [vmem:[%s4991_s20 + $0xe8] sm:$0xff] }
 0x771   : > { %v2796_v33 = vpop.f32.mrf.mxu0  ;;  %v2839_v25 = vpop.f32.mrf.mxu1 }
 0x772   : > { %v3876_v32 = vmul.f32 -1.442695, %v2846_v16  ;;  %v2847_v37 = vadd.f32 %v2796_v33, %v2560_v12  ;;  %v3878_v63 = vmul.f32 -1.442695, %v2848_v54  ;;  %v2849_v5 = vadd.f32 %v2839_v25, %v2562_v46  ;;  %v3886_v12 = vld [vmem:[%s4991_s20 + $0xf0] sm:$0xff] }
 0x773   : > { %v2798_v34 = vpop.f32.mrf.mxu0  ;;  %v2841_v45 = vpop.f32.mrf.mxu1  ;;  %v2914_v33 = vunpack.c.l.bf16 %v3886_v12  ;;  %v2912_v25 = vunpack.c.l.bf16 %v3885_v28 }
 0x774   : > { %4410 = vpow2.f32 %v3876_v32  ;;  %v3877_v55 = vmul.f32 -1.442695, %v2847_v37  ;;  %v2850_v56 = vadd.f32 %v2798_v34, %v2563_v17  ;;  %v2852_v4 = vadd.f32 %v2841_v45, %v2565_v53 }
 0x775   : > { %v2800_v57 = vpop.f32.mrf.mxu0  ;;  %v2843_v11 = vpop.f32.mrf.mxu1  ;;  %v2915_v34 = vunpack.c.h.bf16 %v3886_v12 }
 0x776   : > { %4412 = vpow2.f32 %v3877_v55  ;;  %v3879_v58 = vmul.f32 -1.442695, %v2850_v56  ;;  %v2851_v36 = vadd.f32 %v2800_v57, %v2564_v39  ;;  %v3881_v15 = vmul.f32 -1.442695, %v2852_v4 }
 0x777   : > { %v2853_v20 = vadd.f32 %v2843_v11, %v2566_v7 }
 0x778   : > { %4414 = vpow2.f32 %v3879_v58  ;;  %v3880_v30 = vmul.f32 -1.442695, %v2851_v36 }
 0x77a   : > { %4416 = vpow2.f32 %v3880_v30  ;;  %v3887_v30 = vld [vmem:[%s4991_s20 + $0xf8] sm:$0xff] }
 0x77b   : > { %4418 = vpow2.f32 %v3878_v63  ;;  %v2916_v45 = vunpack.c.l.bf16 %v3887_v30  ;;  %v2913_v63 = vunpack.c.h.bf16 %v3885_v28 }
 0x781   : > { %v4411_v48 = vpop.eup %4410 }
 0x782   : > { %v2872_v8 = vadd.f32 1.0, %v4411_v48 }
 0x783   : > { %v4413_v14 = vpop.eup %4412 }
 0x784   : > { %4420 = vrcp.f32 %v2872_v8  ;;  %v2873_v18 = vadd.f32 1.0, %v4413_v14  ;;  %v2917_v8 = vunpack.c.h.bf16 %v3887_v30 }
 0x785   : > { %v4415_v19 = vpop.eup %4414  ;;  %4422 = vtanh.f32 %v2849_v5 }
 0x786   : > { %4424 = vrcp.f32 %v2873_v18  ;;  %v2875_v24 = vadd.f32 1.0, %v4415_v19 }
 0x787   : > { %v4417_v27 = vpop.eup %4416  ;;  %4426 = vpow2.f32 %v3881_v15 }
 0x788   : > { %4428 = vrcp.f32 %v2875_v24  ;;  %v2876_v59 = vadd.f32 1.0, %v4417_v27  ;;  %v4419_v10 = vpop.eup %4418 }
 0x789   : > { %4430 = vtanh.f32 %v2853_v20  ;;  %v2874_v60 = vadd.f32 1.0, %v4419_v10 }
 0x78a   : > { %4432 = vrcp.f32 %v2876_v59 }
 0x78b   : > { %4434 = vrcp.f32 %v2874_v60 }
 0x791   : > { %v4421_v21 = vpop.eup %4420 }
 0x792   : > { %v4423_v47 = vpop.eup %4422 }
 0x793   : > { %v4425_v50 = vpop.eup %4424  ;;  %v2894_v31 = vmul.f32 %v4423_v47, %v4421_v21 }
 0x794   : > { %v4427_v51 = vpop.eup %4426  ;;  %v2892_v29 = vmul.f32 %v4425_v50, %v5458_v23 }
 0x795   : > { %v4429_v6 = vpop.eup %4428  ;;  %v2877_v1 = vadd.f32 1.0, %v4427_v51 }
 0x796   : > { %v4431_v61 = vpop.eup %4430  ;;  %v5492_v62 = vadd.f32 %v2894_v31, %v2892_v29 }
 0x797   : > { %v4433_v0 = vpop.eup %4432  ;;  %v2895_v3 = vmul.f32 %v4431_v61, %v4429_v6 }
 0x798   : > { %4436 = vtanh.f32 %v5492_v62  ;;  %v2893_v2 = vmul.f32 %v4433_v0, %v5462_v49  ;;  %v4435_v23 = vpop.eup %4434  ;;  %v3884_v49 = vld [vmem:[%s4991_s20 + $0xe0] sm:$0xff] }
 0x799   : > { %4438 = vrcp.f32 %v2877_v1  ;;  %v2910_v9 = vunpack.c.l.bf16 %v3884_v49  ;;  %v2911_v13 = vunpack.c.h.bf16 %v3884_v49 }
 0x79a   : > { %v5496_v35 = vadd.f32 %v2895_v3, %v2893_v2 }
 0x79c   : > { %4440 = vtanh.f32 %v5496_v35 }
 0x7a5   : > { %v4437_v38 = vpop.eup %4436 }
 0x7a6   : > { %v2900_v40 = vmul.f32 %v4437_v38, %v4435_v23  ;;  %v4439_v41 = vpop.eup %4438 }
 0x7a8   : > { %3882 = vst [vmem:[%s5010_s0 + $0x60] sm:$0xff] %v2900_v40 }
 0x7a9   : > { %v4441_v42 = vpop.eup %4440 }
 0x7aa   : > { %v2901_v43 = vmul.f32 %v4441_v42, %v4439_v41 }
 0x7ac   : > { %3883 = vst [vmem:[%s5010_s0 + $0x68] sm:$0xff] %v2901_v43  ;;  %v2918_v44 = vpack.c.bf16 %v2901_v43, %v2900_v40 }
 0x7ae   : > { %3144 = vmatmul.mubr.bf16.vlgmr.msra.gmra.mxu0 %v2918_v44  ;;  %3187 = vmatmul.mubr.bf16.vlgmr.msra.gmra.mxu1 %v2918_v44 }
 0x86e   : > { %v3145_v16 = vpop.f32.mrf.mxu0  ;;  %v3188_v55 = vpop.f32.mrf.mxu1 }
 0x86f   : > { %v3197_v17 = vadd.f32 %v3145_v16, %v2910_v9  ;;  %v3199_v53 = vadd.f32 %v3188_v55, %v2912_v25 }
 0x870   : > { %v3147_v32 = vpop.f32.mrf.mxu0  ;;  %v3190_v26 = vpop.f32.mrf.mxu1 }
 0x871   : > { %v3920_v37 = vmul.f32 -1.442695, %v3197_v17  ;;  %v3198_v39 = vadd.f32 %v3147_v32, %v2911_v13  ;;  %v3922_v4 = vmul.f32 -1.442695, %v3199_v53  ;;  %v3200_v7 = vadd.f32 %v3190_v26, %v2913_v63 }
 0x872   : > { %v3149_v52 = vpop.f32.mrf.mxu0  ;;  %v3192_v46 = vpop.f32.mrf.mxu1 }
 0x873   : > { %4442 = vpow2.f32 %v3920_v37  ;;  %v3921_v56 = vmul.f32 -1.442695, %v3198_v39  ;;  %v3201_v57 = vadd.f32 %v3149_v52, %v2914_v33  ;;  %v3203_v48 = vadd.f32 %v3192_v46, %v2916_v45 }
 0x874   : > { %v3151_v58 = vpop.f32.mrf.mxu0  ;;  %v3194_v14 = vpop.f32.mrf.mxu1 }
 0x875   : > { %4444 = vpow2.f32 %v3921_v56  ;;  %v3923_v36 = vmul.f32 -1.442695, %v3201_v57  ;;  %v3202_v22 = vadd.f32 %v3151_v58, %v2915_v34  ;;  %v3925_v18 = vmul.f32 -1.442695, %v3203_v48 }
 0x876   : > { %v3204_v24 = vadd.f32 %v3194_v14, %v2917_v8 }
 0x877   : > { %4446 = vpow2.f32 %v3923_v36  ;;  %v3924_v54 = vmul.f32 -1.442695, %v3202_v22 }
 0x879   : > { %4448 = vpow2.f32 %v3924_v54 }
 0x87a   : > { %4450 = vpow2.f32 %v3922_v4 }
 0x880   : > { %v4443_v5 = vpop.eup %4442 }
 0x881   : > { %v3223_v11 = vadd.f32 1.0, %v4443_v5 }
 0x882   : > { %v4445_v15 = vpop.eup %4444 }
 0x883   : > { %4452 = vrcp.f32 %v3223_v11  ;;  %v3224_v19 = vadd.f32 1.0, %v4445_v15 }
 0x884   : > { %v4447_v20 = vpop.eup %4446  ;;  %4454 = vtanh.f32 %v3200_v7 }
 0x885   : > { %4456 = vrcp.f32 %v3224_v19  ;;  %v3226_v27 = vadd.f32 1.0, %v4447_v20 }
 0x886   : > { %v4449_v59 = vpop.eup %4448  ;;  %4458 = vpow2.f32 %v3925_v18 }
 0x887   : > { %4460 = vrcp.f32 %v3226_v27  ;;  %v3227_v10 = vadd.f32 1.0, %v4449_v59  ;;  %v4451_v21 = vpop.eup %4450 }
 0x888   : > { %4462 = vtanh.f32 %v3204_v24  ;;  %v3225_v51 = vadd.f32 1.0, %v4451_v21 }
 0x889   : > { %4464 = vrcp.f32 %v3227_v10 }
 0x88a   : > { %4466 = vrcp.f32 %v3225_v51 }
 0x890   : > { %v4453_v47 = vpop.eup %4452 }
 0x891   : > { %v4455_v50 = vpop.eup %4454 }
 0x892   : > { %v4457_v60 = vpop.eup %4456  ;;  %v3245_v6 = vmul.f32 %v4455_v50, %v4453_v47 }
 0x893   : > { %v4459_v29 = vpop.eup %4458  ;;  %v3243_v31 = vmul.f32 %v4457_v60, %v5492_v62 }
 0x894   : > { %v4461_v61 = vpop.eup %4460  ;;  %v3228_v3 = vadd.f32 1.0, %v4459_v29 }
 0x895   : > { %v4463_v0 = vpop.eup %4462  ;;  %v3247_v1 = vadd.f32 %v3245_v6, %v3243_v31 }
 0x896   : > { %v4465_v2 = vpop.eup %4464  ;;  %v3246_v38 = vmul.f32 %v4463_v0, %v4461_v61 }
 0x897   : > { %4468 = vtanh.f32 %v3247_v1  ;;  %3258 = vst [vmem:[#allocation3 + $0x8] sm:$0xff] %v3247_v1  ;;  %v3244_v23 = vmul.f32 %v4465_v2, %v5496_v35  ;;  %v4467_v41 = vpop.eup %4466 }
 0x898   : > { %4470 = vrcp.f32 %v3228_v3 }
 0x899   : > { %v3248_v40 = vadd.f32 %v3246_v38, %v3244_v23 }
 0x89b   : > { %4472 = vtanh.f32 %v3248_v40  ;;  %3259 = vst [vmem:[#allocation3] sm:$0xff] %v3248_v40 }
 0x8a4   : > { %v4469_v62 = vpop.eup %4468 }
 0x8a5   : > { %v3251_v42 = vmul.f32 %v4469_v62, %v4467_v41  ;;  %v4471_v43 = vpop.eup %4470 }
 0x8a7   : > { %3926 = vst [vmem:[%s5010_s0 + $0x70] sm:$0xff] %v3251_v42  ;;  %3256 = vst [vmem:[#allocation2] sm:$0xff] %v3251_v42  ;;  %3263 = sbr.rel (%p3928_p8) target bundleno = 2222 (0x8ae), region = 60 }
 0x8a8   : > { %v4473_v44 = vpop.eup %4472 }
 0x8a9   : > { %v3252_v49 = vmul.f32 %v4473_v44, %v4471_v43 }
 0x8ab   : > { %3927 = vst [vmem:[%s5010_s0 + $0x78] sm:$0xff] %v3252_v49  ;;  %3257 = vst [vmem:[#allocation2 + $0x8] sm:$0xff] %v3252_v49 }
 0x8ac   : > { %3264 = vst [vmem:[%s5012_s15] sm:$0xff] %v3251_v42  ;;  %3265 = vst [vmem:[%s5012_s15 + $0x8] sm:$0xff] %v3252_v49 }
 0x8ad   : > { %3266 = vst [vmem:[%s5014_s12] sm:$0xff] %v3247_v1  ;;  %3267 = vst [vmem:[%s5014_s12 + $0x8] sm:$0xff] %v3248_v40 }
 0x8ae PF: > { %s3269_s11 = scalar_lea.sflag [#allocation6], %s4987_s28  ;;  %s5517_s18 = scalar_lea.sflag [#allocation14], %s359_s19 }
 0x8af   : > { %s5707_s3 = sld [smem:[#allocation28_spill]]  ;;  %s3946_s6 = sshll.u32 %s4694_s27, 5 }
 0x8b0   : > { %s5708_s26 = sld [smem:[#allocation34_spill]]  ;;  %s3305_s29 = sshll.u32 %s5010_s0, 4  ;;  %s3306_s29 = int_to_ptr.vmem [resolvable:$true] %s3305_s29 }
 0x8b1   : > { %s5709_s5 = sld [smem:[#allocation40_spill]]  ;;  %s4726_s19 = smov 256  }
 0x8b2   : > { %s4727_s13 = smov 512   ;;  %s4728_s21 = smov 2  }
 0x8b3   : > { %s4729_s27 = smov 128   ;;  %s4730_s14 = smov 8  }
 0x8b4   : > { %s4731_s24 = smov 131072   ;;  %s4732_s17 = smov 0  }
 0x8b5   : > { %s3933_s9 = sshll.u32 %s5707_s3, 1  ;;  %s3947_s0 = sshll.u32 %s5707_s3, 8 }
 0x8b6   : > { %s3292_s10 = sadd.s32 %s3946_s6, %s3933_s9  ;;  %p5710_p0 = scmp.ne.s32.totalorder %s5708_s26, 0 }
 0x8b7   : > { %s3935_s4 = sshll.u32 %s3292_s10, 7  ;;  %s3334_s9 = sshll.u32 %s5012_s15, 4  ;;  %s5548_s9 = int_to_ptr.vmem [resolvable:$true] %s3334_s9 }
 0x8b8   : > { %s3294_s20 = scalar_lea.hbm %s5709_s5, %s3935_s4  ;;  %3966 = sst [smem:[#allocation19]] (%p5710_p0), %s4726_s19 }
 0x8b9   : > { %3967 = sst [smem:[#allocation19 + $0x1]] (%p5710_p0), %s4727_s13  ;;  %s4552_s8 = scalar_lea.vmem %s5548_s9, 256 }
 0x8ba   : > { %3968 = sst [smem:[#allocation19 + $0x2]] (%p5710_p0), %s4728_s21  ;;  %p4553_p11 = scmp.ne.s32.totalorder %s5548_s9, %s4552_s8 }
 0x8bb   : > { %3969 = sst [smem:[#allocation19 + $0x3]] (%p5710_p0), %s4729_s27 }
 0x8bc   : > { %3970 = sst [smem:[#allocation19 + $0x4]] (%p5710_p0), %s4729_s27 }
 0x8bd   : > { %3971 = sst [smem:[#allocation19 + $0x5]] (%p5710_p0), %s4730_s14 }
 0x8be   : > { %3972 = dma.general (%p5710_p0), %s3306_s29, 2048, %s3294_s20, %s3269_s11, %s4731_s24, [#allocation19], %s4732_s17, 0  }
 0x8bf   : > { %s5711_s16 = sld [smem:[#allocation35_spill]]  ;;  %s4733_s11 = smov [#allocation13]  }
 0x8c0   : > { %s5712_s4 = sld [smem:[#allocation41_spill]]  ;;  %s4556_s26 = sshll.u32 %s4733_s11, 4  ;;  %s4557_s26 = int_to_ptr.vmem [resolvable:$false] %s4556_s26 }
 0x8c1   : > { %s4558_s15 = scalar_lea.vmem %s4557_s26, 512  ;;  %p4559_p13 = scmp.lt.s32.totalorder %s5548_s9, %s4557_s26 }
 0x8c2   : > { %p4560_p6 = scmp.lt.s32.totalorder %s4558_s15, %s4552_s8 }
 0x8c4   : > { %p4561_p7 = por %p4560_p6, %p4559_p13 }
 0x8c5   : > { %p5713_p9 = scmp.ne.s32.totalorder %s5711_s16, 0 }
 0x8c6   : > { %s5546_s28 = scalar_lea.hbm %s5712_s4, %s3947_s0 }
 0x8c7   : > { %p4554_p4 = pnand %p4553_p11, %p5713_p9 }
 0x8c9   : > { %p4555_p5 = pneg %p4554_p4 }
 0x8cb   : > { %p4562_p12 = pnand %p4561_p7, %p4555_p5 }
 0x8cd   : > { %4565 = shalt.err (!%p4562_p12)
}
 0x8ce   : > { %s4566_s29 = scalar_lea.hbm %s5546_s28, 256  ;;  %s4570_s19 = scalar_lea.hbm %s5712_s4, 512 }
 0x8cf   : > { %p4567_p1 = scmp.ne.s32.totalorder %s5546_s28, %s4566_s29  ;;  %p4571_p10 = scmp.lt.s32.totalorder %s5546_s28, %s5712_s4 }
 0x8d0   : > { %p4572_p8 = scmp.lt.s32.totalorder %s4570_s19, %s4566_s29 }
 0x8d1   : > { %p4568_p3 = pnand %p4567_p1, %p5713_p9 }
 0x8d2   : > { %p4573_p0 = por %p4572_p8, %p4571_p10 }
 0x8d3   : > { %p4569_p2 = pneg %p4568_p3 }
 0x8d5   : > { %p4574_p11 = pnand %p4573_p0, %p4569_p2 }
 0x8d7   : > { %4577 = shalt.err (!%p4574_p11)
}
 0x8d8   : > { %s4734_s27 = smov 128   ;;  %s4735_s14 = smov 8  }
 0x8d9   : > { %3973 = dma.vmem_to_hbm [thread:$0]  (%p5713_p9), %s5548_s9, 256, %s5546_s28, %s5517_s18, %s4734_s27, %s4734_s27, %s4735_s14  }
 0x8da   : > { %s5714_s6 = sld [smem:[#allocation42_spill]]  ;;  %s3350_s8 = sshll.u32 %s5014_s12, 4  ;;  %s3351_s8 = int_to_ptr.vmem [resolvable:$true] %s3350_s8 }
 0x8db   : > { %s4578_s11 = scalar_lea.vmem %s3351_s8, 256  ;;  %s4736_s26 = smov [#allocation15]  }
 0x8dc   : > { %p4579_p4 = scmp.ne.s32.totalorder %s3351_s8, %s4578_s11  ;;  %s4582_s15 = sshll.u32 %s4736_s26, 4  ;;  %s4583_s15 = int_to_ptr.vmem [resolvable:$false] %s4582_s15 }
 0x8dd   : > { %s4584_s29 = scalar_lea.vmem %s4583_s15, 512  ;;  %p4585_p6 = scmp.lt.s32.totalorder %s3351_s8, %s4583_s15 }
 0x8de   : > { %p4580_p5 = pnand %p4579_p4, %p5713_p9  ;;  %p4586_p7 = scmp.lt.s32.totalorder %s4584_s29, %s4578_s11 }
 0x8e0   : > { %s5579_s10 = scalar_lea.hbm %s5714_s6, %s3947_s0  ;;  %p4581_p13 = pneg %p4580_p5 }
 0x8e1   : > { %p4587_p12 = por %p4586_p7, %p4585_p6 }
 0x8e3   : > { %p4588_p1 = pnand %p4587_p12, %p4581_p13 }
 0x8e5   : > { %4591 = shalt.err (!%p4588_p1)
}
 0x8e6   : > { %s4592_s12 = scalar_lea.hbm %s5579_s10, 256  ;;  %s4596_s9 = scalar_lea.hbm %s5714_s6, 512 }
 0x8e7   : > { %p4593_p3 = scmp.ne.s32.totalorder %s5579_s10, %s4592_s12  ;;  %p4597_p8 = scmp.lt.s32.totalorder %s5579_s10, %s5714_s6 }
 0x8e8   : > { %p4598_p0 = scmp.lt.s32.totalorder %s4596_s9, %s4592_s12 }
 0x8e9   : > { %p4594_p2 = pnand %p4593_p3, %p5713_p9 }
 0x8ea   : > { %p4599_p11 = por %p4598_p0, %p4597_p8 }
 0x8eb   : > { %p4595_p10 = pneg %p4594_p2 }
 0x8ed   : > { %p4600_p4 = pnand %p4599_p11, %p4595_p10 }
 0x8ef   : > { %4603 = shalt.err (!%p4600_p4)
}
 0x8f0   : > { %3974 = dma.vmem_to_hbm [thread:$0]  (%p5713_p9), %s3351_s8, 256, %s5579_s10, %s5517_s18, %s4734_s27, %s4734_s27, %s4735_s14  }
 0x8f1 PF: > { %s5715_s20 = sld [smem:[#allocation26_spill]]  ;;  %p3994_p5 = scmp.ge.s32.totalorder %s4710_s7, 2 }
 0x8f2   : > { %s5716_s19 = sld [smem:[#allocation36_spill]] }
 0x8f7   : > { %s3365_s13 = sand.u32 1, %s5715_s20  }
 0x8f8   : > { %p5717_p13 = scmp.ne.s32.totalorder %s5716_s19, 0  ;;  %s3366_s21 = scalar_lea.sflag [#allocation6], %s3365_s13 }
 0x8fa   : > { %p3983_p6 = pnand %p3994_p5, %p5717_p13 }
 0x8fc   : > { %p3984_p7 = pneg %p3983_p6 }
 0x8fe   : > { %4661 = dma.done.wait (%p3984_p7), %s3366_s21, 2048  }
 0x8ff   : > { %4663 = vsyncadd (%p3984_p7), %s3366_s21, 4294965248  ;;  %s5718_s16 = sadd.s32 4294967294, %s4710_s7   ;;  %s5719_s24 = sld [smem:[#allocation37_spill]] }
 0x900   : > { %s3374_s17 = sand.u32 1, %s5718_s16  }
 0x901   : > { %s3375_s18 = scalar_lea.sflag [#allocation14], %s3374_s17 }
 0x905   : > { %p5720_p12 = scmp.ne.s32.totalorder %s5719_s24, 0 }
 0x907   : > { %p3986_p1 = pnand %p3994_p5, %p5720_p12 }
 0x909   : > { %p3987_p3 = pneg %p3986_p1 }
 0x90b   : > { %4665 = dma.done.wait (%p3987_p3), %s3375_s18, 512  }
 0x90c   : > { %4667 = vsyncadd (%p3987_p3), %s3375_s18, 4294966784  ;;  %s30_s7 = sadd.s32 1, %s4710_s7   ;;  %s5721_s27 = sld [smem:[#allocation32_spill]] }
 0x90d   : > { %p27_p9 = scmp.ge.s32.totalorder %s30_s7, 6   ;;  %s5722_s14 = sld [smem:[#allocation27_spill]] }
 0x90e   : > { %s5723_s26 = sld [smem:[#allocation33_spill]]  ;;  %s5727_s21 = smov %s4674_s22 }
 0x90f   : > { %s5724_s10 = sld [smem:[#allocation29_spill]]  ;;  %s5728_s22 = smov %s4678_s23 }
 0x910   : > { %s5725_s29 = sld [smem:[#allocation30_spill]]  ;;  %s5730_s24 = smov %s4686_s25 }
 0x911   : > { %s5726_s8 = sld [smem:[#allocation31_spill]]  ;;  %s5733_s28 = smov %s4706_s30 }
 0x912   : > { %s5729_s23 = smov %s5721_s27 }
 0x913   : > { %s5731_s25 = smov %s5722_s14  ;;  %29 = sbr.rel (!%p27_p9) target bundleno = 20 (0x14), region = 173 }
 0x915   : > { %s5732_s27 = smov %s5724_s10 }
 0x917   : > { %s5734_s30 = smov %s5726_s8 }
 0x918   :  { %3389 = vsyncpa [#allocation5], 1 }
 0x919   :  { %3391 = vsyncpa [#allocation5 + $0x1], 1 }
 0x91a   :  { %3392 = vsyncpa [#allocation8], 1 }
 0x91b   :  { %3394 = vsyncpa [#allocation8 + $0x1], 1 }
 0x91c   :  { %3395 = vsyncpa [#allocation11], 1 }
 0x91d   :  { %3396 = vsyncpa [#allocation6], 1 }
 0x91e   :  { %3398 = vsyncpa [#allocation6 + $0x1], 1 }
 0x91f   :  { %3399 = vsyncpa [#allocation14], 1 }
 0x920   :  { %3401 = vsyncpa [#allocation14 + $0x1], 1 }

</bundles_post_ra>
